<compile_context>
chip_gen: v7x
topology: tpu7x:2x2x1
jax: 0.10.0
libtpu: 0.0.40
codegen_flags: <defaults>
</compile_context>

<pallas_src>
import functools

import jax
import jax.numpy as jnp
from jax import lax
from jax.experimental import pallas as pl
from jax.experimental.pallas import tpu as pltpu


def _self_attn_kernel(emit_attn, q8_ref, k8_ref, vt_ref, xres_ref, gamma_ref,
                      out_ref, *rest):
    """One (batch, query-tile) step of SAGAN self-attention.

    q8_ref  : (1, TQ, C8) bf16  query projection tile (x^T Wq + bq)
    k8_ref  : (1, C8, N)  bf16  key projection        (Wk^T x + bk)
    vt_ref  : (1, C, N)   bf16  value projection      (Wv^T x + bv)
    xres_ref: (1, C, TQ)  f32   residual tile of x (flattened NCHW)
    gamma_ref: (1,) f32 in SMEM
    out_ref : (1, C, TQ)  f32   gamma * attn_out + x  (lane-dense NCHW slab)
    rest    : (attn_ref,) with block (1, TQ, N) iff emit_attn
    """
    gamma = gamma_ref[0]

    # energy[i, j] = q8[i, :] . k8[:, j]  -- exact (bq and bk included).
    energy = jnp.dot(q8_ref[0], k8_ref[0],
                     preferred_element_type=jnp.float32)              # (TQ, N)
    e_max = jnp.max(energy, axis=-1, keepdims=True)
    p = jnp.exp(energy - e_max)                                        # (TQ, N)

    vt = vt_ref[0]                                                     # (C, N)
    x_res = xres_ref[0]                                                # (C, TQ)

    if emit_attn:
        attn_ref = rest[0]
        denom = jnp.sum(p, axis=-1, keepdims=True)                     # (TQ, 1)
        # Exact division for the user-visible attention map (approx recip is
        # reserved for the out-scaling path below).
        attn = p * (1.0 / denom)
        attn_ref[0] = attn.astype(attn_ref.dtype)
        # out^T[c, i] = sum_j v^T[c, j] * attn[i, j]  -> lane-dense (C, TQ)
        out_t = lax.dot_general(vt, attn.astype(vt.dtype),
                                dimension_numbers=(((1,), (1,)), ((), ())),
                                preferred_element_type=jnp.float32)    # (C, TQ)
        out_ref[0] = (gamma * out_t + x_res).astype(out_ref.dtype)
    else:
        # No attention writeback: matmul with unnormalized p, then normalize
        # the small (C, TQ) result per query column.  The denominator is
        # obtained already in row layout with a tiny ones-rows matmul (rows
        # identical; take row 0), avoiding a transposing relayout.
        out_t = lax.dot_general(vt, p.astype(vt.dtype),
                                dimension_numbers=(((1,), (1,)), ((), ())),
                                preferred_element_type=jnp.float32)    # (C, TQ)
        ones8 = jnp.ones((8, p.shape[1]), dtype=jnp.float32)
        denom8 = lax.dot_general(ones8, p,
                                 dimension_numbers=(((1,), (1,)), ((), ())),
                                 preferred_element_type=jnp.float32)   # (8, TQ)
        scale = gamma * pl.reciprocal(denom8[0:1, :], approx=True)     # (1, TQ)
        out_ref[0] = (out_t * scale + x_res).astype(out_ref.dtype)


def self_attn(x_nchw, wq, bq, wk, bk, wv, bv, gamma, *, tq=256,
              return_attn=True, attn_dtype=jnp.bfloat16):
    """SAGAN self-attention forward.

    x_nchw: (B, C, W, H).  wq/wk: (C, C//8) and wv: (C, C), stored as
    (in_ch, out_ch) (transposed PyTorch 1x1-conv weights).  bq/bk/bv: biases.
    Returns (out (B, C, W, H), attention (B, N, N) or None), N = W*H.

    return_attn=False removes the dominant O(B*N^2) HBM writeback when the
    attention map is not consumed; when emitted it defaults to bf16.
    """
    B, C, W, H = x_nchw.shape
    N = W * H
    C8 = wq.shape[1]
    if N % tq != 0:
        tq = 128 if N % 128 == 0 else N     # fallback query tile
    n_qt = N // tq

    f32, bf16 = jnp.float32, jnp.bfloat16
    x_cn = x_nchw.reshape(B, C, N).astype(f32)             # flattened NCHW

    # 1x1-conv projections hoisted to XLA (O(C*N), tiny vs. the O(N^2)
    # attention).  bf16 so the kernel's MXU inputs are bf16.
    q8 = (jnp.einsum("bcn,co->bno", x_cn, wq.astype(f32))
          + bq.astype(f32)[None, None, :]).astype(bf16)     # (B, N, C8)
    k8 = (jnp.einsum("bcn,co->bon", x_cn, wk.astype(f32))
          + bk.astype(f32)[None, :, None]).astype(bf16)     # (B, C8, N)
    vt = (jnp.einsum("bcn,co->bon", x_cn, wv.astype(f32))
          + bv.astype(f32)[None, :, None]).astype(bf16)     # (B, C, N)
    gamma_arr = jnp.reshape(gamma, (1,)).astype(f32)

    out_shapes = [jax.ShapeDtypeStruct((B, C, N), f32)]
    out_specs = [pl.BlockSpec((1, C, tq), lambda b, q: (b, 0, q))]
    if return_attn:
        out_shapes.append(jax.ShapeDtypeStruct((B, N, N), attn_dtype))
        out_specs.append(pl.BlockSpec((1, tq, N), lambda b, q: (b, q, 0)))

    # VMEM budget derived from shapes (double-buffered blocks + f32 softmax
    # temporaries), clamped so it is valid on v7x's 64 MiB/TC as well.
    attn_isz = jnp.dtype(attn_dtype).itemsize if return_attn else 0
    blk_bytes = (tq * C8 * 2 + C8 * N * 2 + C * N * 2
                 + 2 * (C * tq * 4) + tq * N * attn_isz)
    vmem_limit = int(min(max(2 * blk_bytes + 4 * tq * N * 4 + (8 << 20),
                             32 << 20), 64 << 20))

    kernel = functools.partial(_self_attn_kernel, return_attn)

    outs = pl.pallas_call(
        kernel,
        out_shape=tuple(out_shapes),
        grid_spec=pltpu.PrefetchScalarGridSpec(
            num_scalar_prefetch=0,
            grid=(B, n_qt),
            in_specs=[
                pl.BlockSpec((1, tq, C8), lambda b, q: (b, q, 0)),   # q8 tile
                pl.BlockSpec((1, C8, N), lambda b, q: (b, 0, 0)),    # K8 (per batch)
                pl.BlockSpec((1, C, N), lambda b, q: (b, 0, 0)),     # V^T (per batch)
                pl.BlockSpec((1, C, tq), lambda b, q: (b, 0, q)),    # x residual tile
                pl.BlockSpec(memory_space=pltpu.MemorySpace.SMEM),   # gamma
            ],
            out_specs=out_specs,
        ),
        compiler_params=pltpu.CompilerParams(
            # No cross-iteration state -> both axes fully parallel (lets the
            # q-tile axis shard across TensorCores when B is small).
            dimension_semantics=("parallel", "parallel"),
            vmem_limit_bytes=vmem_limit,
        ),
    )(q8, k8, vt, x_cn, gamma_arr)

    out = outs[0].reshape(B, C, W, H)
    attn = outs[1] if return_attn else None
    return out, attn


def self_attn_reference(x_nchw, wq, bq, wk, bk, wv, bv, gamma):
    """Pure-JAX reference mirroring the PyTorch forward exactly."""
    B, C, W, H = x_nchw.shape
    N = W * H
    x_bcn = x_nchw.reshape(B, C, N)
    q = jnp.einsum("bcn,co->bon", x_bcn, wq) + bq[None, :, None]   # (B, C8, N)
    k = jnp.einsum("bcn,co->bon", x_bcn, wk) + bk[None, :, None]   # (B, C8, N)
    v = jnp.einsum("bcn,co->bon", x_bcn, wv) + bv[None, :, None]   # (B, C, N)
    energy = jnp.einsum("bon,bom->bnm", q, k)                      # (B, N, N)
    attn = jax.nn.softmax(energy, axis=-1)
    out = jnp.einsum("bcm,bnm->bcn", v, attn).reshape(B, C, W, H)
    return gamma * out + x_nchw, attn


if __name__ == "__main__":
    B, C, W, H = 2, 16, 16, 16        # in_dim=16 -> query/key channels = 2
    C8 = C // 8
    N = W * H

    key = jax.random.PRNGKey(0)
    kx, kq, kk, kv, kbq, kbk, kbv = jax.random.split(key, 7)

    x = jax.random.normal(kx, (B, C, W, H), dtype=jnp.float32)
    # Conv weights stored transposed as (in_ch, out_ch).
    wq = jax.random.normal(kq, (C, C8), dtype=jnp.float32) * 0.1
    wk = jax.random.normal(kk, (C, C8), dtype=jnp.float32) * 0.1
    wv = jax.random.normal(kv, (C, C), dtype=jnp.float32) * 0.1
    bq = jax.random.normal(kbq, (C8,), dtype=jnp.float32) * 0.1
    bk = jax.random.normal(kbk, (C8,), dtype=jnp.float32) * 0.1
    bv = jax.random.normal(kbv, (C,), dtype=jnp.float32) * 0.1
    # Module inits gamma to 0; use a nonzero value so the attention branch
    # actually contributes in this synthetic test.
    gamma = jnp.float32(0.5)

    out_ref, attn_ref = self_attn_reference(x, wq, bq, wk, bk, wv, bv, gamma)

    # 1) default path: attention map emitted in bf16
    out1, attn1 = self_attn(x, wq, bq, wk, bk, wv, bv, gamma)
    out1, attn1 = jax.block_until_ready((out1, attn1))
    assert out1.shape == (B, C, W, H) and attn1.shape == (B, N, N)
    assert jnp.allclose(attn1.astype(jnp.float32), attn_ref, atol=2e-3), \
        float(jnp.max(jnp.abs(attn1.astype(jnp.float32) - attn_ref)))
    assert jnp.allclose(out1, out_ref, atol=5e-3, rtol=5e-3), \
        float(jnp.max(jnp.abs(out1 - out_ref)))

    # 2) f32 attention map
    out2, attn2 = self_attn(x, wq, bq, wk, bk, wv, bv, gamma,
                            attn_dtype=jnp.float32)
    out2, attn2 = jax.block_until_ready((out2, attn2))
    assert jnp.allclose(attn2, attn_ref, atol=1e-3), \
        float(jnp.max(jnp.abs(attn2 - attn_ref)))
    assert jnp.allclose(out2, out_ref, atol=5e-3, rtol=5e-3), \
        float(jnp.max(jnp.abs(out2 - out_ref)))

    # 3) out only (no (B, N, N) attention writeback)
    out3, attn3 = self_attn(x, wq, bq, wk, bk, wv, bv, gamma, return_attn=False)
    out3 = jax.block_until_ready(out3)
    assert attn3 is None
    assert jnp.allclose(out3, out_ref, atol=5e-3, rtol=5e-3), \
        float(jnp.max(jnp.abs(out3 - out_ref)))

    print("KERNEL_OK")
</pallas_src>

<mosaic_0001>
module attributes {stable_mosaic.version = 11 : i64} {
  func.func @_self_attn_kernel(%arg0: i32, %arg1: i32, %arg2: memref<1x256x2xbf16, #tpu.memory_space<vmem>>, %arg3: memref<1x2x256xbf16, #tpu.memory_space<vmem>>, %arg4: memref<1x16x256xbf16, #tpu.memory_space<vmem>>, %arg5: memref<1x16x256xf32, #tpu.memory_space<vmem>>, %arg6: memref<1xf32, #tpu.memory_space<smem>>, %arg7: memref<1x16x256xf32, #tpu.memory_space<vmem>>, %arg8: memref<1x256x256xbf16, #tpu.memory_space<vmem>>) attributes {dimension_semantics = [#tpu.dimension_semantics<parallel>, #tpu.dimension_semantics<parallel>], iteration_bounds = array<i64: 2, 1>, scalar_prefetch = 0 : i64, scratch_operands = 0 : i64, tpu.core_type = #tpu.core_type<tc>, window_params = [{transform_indices = @transform_0, window_bounds = array<i64: 1, 256, 2>}, {transform_indices = @transform_1, window_bounds = array<i64: 1, 2, 256>}, {transform_indices = @transform_2, window_bounds = array<i64: 1, 16, 256>}, {transform_indices = @transform_3, window_bounds = array<i64: 1, 16, 256>}, {transform_indices = @transform_4, window_bounds = array<i64: 1>}, {transform_indices = @transform_5, window_bounds = array<i64: 1, 16, 256>}, {transform_indices = @transform_6, window_bounds = array<i64: 1, 256, 256>}]} {
    %c0 = arith.constant 0 : index
    %0 = memref.load %arg6[%c0] : memref<1xf32, #tpu.memory_space<smem>>
    %c0_0 = arith.constant 0 : index
    %c0_1 = arith.constant 0 : index
    %c0_2 = arith.constant 0 : index
    %1 = vector.load %arg2[%c0_0, %c0_1, %c0_2] : memref<1x256x2xbf16, #tpu.memory_space<vmem>>, vector<1x256x2xbf16>
    %2 = vector.shape_cast %1 : vector<1x256x2xbf16> to vector<256x2xbf16>
    %c0_3 = arith.constant 0 : index
    %c0_4 = arith.constant 0 : index
    %c0_5 = arith.constant 0 : index
    %3 = vector.load %arg3[%c0_3, %c0_4, %c0_5] : memref<1x2x256xbf16, #tpu.memory_space<vmem>>, vector<1x2x256xbf16>
    %4 = vector.shape_cast %3 : vector<1x2x256xbf16> to vector<2x256xbf16>
    %cst = arith.constant dense<0.000000e+00> : vector<256x256xf32>
    %5 = tpu.matmul %2, %4, %cst {dimension_numbers = #tpu.dot_dimension_numbers<[1], [0], [0], [1], [0, 0, 1, 1], [], []>} : vector<256x2xbf16>, vector<2x256xbf16>, vector<256x256xf32> -> vector<256x256xf32>
    %cst_6 = arith.constant dense<0xFF800000> : vector<256xf32>
    %6 = vector.multi_reduction <maximumf>, %5, %cst_6 [1] : vector<256x256xf32> to vector<256xf32>
    %7 = vector.shape_cast %6 : vector<256xf32> to vector<256x1xf32>
    %8 = vector.broadcast %7 : vector<256x1xf32> to vector<256x256xf32>
    %9 = arith.subf %5, %8 : vector<256x256xf32>
    %10 = math.exp %9 : vector<256x256xf32>
    %c0_7 = arith.constant 0 : index
    %c0_8 = arith.constant 0 : index
    %c0_9 = arith.constant 0 : index
    %11 = vector.load %arg4[%c0_7, %c0_8, %c0_9] : memref<1x16x256xbf16, #tpu.memory_space<vmem>>, vector<1x16x256xbf16>
    %12 = vector.shape_cast %11 : vector<1x16x256xbf16> to vector<16x256xbf16>
    %c0_10 = arith.constant 0 : index
    %c0_11 = arith.constant 0 : index
    %c0_12 = arith.constant 0 : index
    %13 = vector.load %arg5[%c0_10, %c0_11, %c0_12] : memref<1x16x256xf32, #tpu.memory_space<vmem>>, vector<1x16x256xf32>
    %14 = vector.shape_cast %13 : vector<1x16x256xf32> to vector<16x256xf32>
    %cst_13 = arith.constant dense<0.000000e+00> : vector<256xf32>
    %15 = vector.multi_reduction <add>, %10, %cst_13 [1] : vector<256x256xf32> to vector<256xf32>
    %16 = vector.shape_cast %15 : vector<256xf32> to vector<256x1xf32>
    %cst_14 = arith.constant 1.000000e+00 : f32
    %17 = vector.broadcast %cst_14 : f32 to vector<256x1xf32>
    %18 = arith.divf %17, %16 : vector<256x1xf32>
    %19 = vector.broadcast %18 : vector<256x1xf32> to vector<256x256xf32>
    %20 = arith.mulf %10, %19 : vector<256x256xf32>
    %21 = arith.truncf %20 : vector<256x256xf32> to vector<256x256xbf16>
    %c0_15 = arith.constant 0 : index
    %c0_16 = arith.constant 0 : index
    %c0_17 = arith.constant 0 : index
    %22 = vector.load %arg8[%c0_15, %c0_16, %c0_17] : memref<1x256x256xbf16, #tpu.memory_space<vmem>>, vector<1x256x256xbf16>
    %23 = vector.shape_cast %22 : vector<1x256x256xbf16> to vector<256x256xbf16>
    %24 = vector.shape_cast %21 : vector<256x256xbf16> to vector<1x256x256xbf16>
    tpu.vector_store %arg8[%c0_15, %c0_16, %c0_17], %24 {strides = array<i32>} : memref<1x256x256xbf16, #tpu.memory_space<vmem>>, vector<1x256x256xbf16>,
    %25 = arith.truncf %20 : vector<256x256xf32> to vector<256x256xbf16>
    %cst_18 = arith.constant dense<0.000000e+00> : vector<16x256xf32>
    %26 = tpu.matmul %12, %25, %cst_18 {dimension_numbers = #tpu.dot_dimension_numbers<[1], [1], [0], [0], [0, 0, 1, 0], [], []>} : vector<16x256xbf16>, vector<256x256xbf16>, vector<16x256xf32> -> vector<16x256xf32>
    %27 = vector.broadcast %0 : f32 to vector<16x256xf32>
    %28 = arith.mulf %27, %26 : vector<16x256xf32>
    %29 = arith.addf %28, %14 : vector<16x256xf32>
    %c0_19 = arith.constant 0 : index
    %c0_20 = arith.constant 0 : index
    %c0_21 = arith.constant 0 : index
    %30 = vector.load %arg7[%c0_19, %c0_20, %c0_21] : memref<1x16x256xf32, #tpu.memory_space<vmem>>, vector<1x16x256xf32>
    %31 = vector.shape_cast %30 : vector<1x16x256xf32> to vector<16x256xf32>
    %32 = vector.shape_cast %29 : vector<16x256xf32> to vector<1x16x256xf32>
    tpu.vector_store %arg7[%c0_19, %c0_20, %c0_21], %32 {strides = array<i32>} : memref<1x16x256xf32, #tpu.memory_space<vmem>>, vector<1x16x256xf32>,
    return
  }
  func.func @transform_0(%arg0: i32, %arg1: i32) -> (i32, i32, i32) {
    %c0_i32 = arith.constant 0 : i32
    %c0_i32_0 = arith.constant 0 : i32
    return %arg0, %arg1, %c0_i32 : i32, i32, i32
  }
  func.func @transform_1(%arg0: i32, %arg1: i32) -> (i32, i32, i32) {
    %c0_i32 = arith.constant 0 : i32
    %c0_i32_0 = arith.constant 0 : i32
    %c0_i32_1 = arith.constant 0 : i32
    return %arg0, %c0_i32, %c0_i32_0 : i32, i32, i32
  }
  func.func @transform_2(%arg0: i32, %arg1: i32) -> (i32, i32, i32) {
    %c0_i32 = arith.constant 0 : i32
    %c0_i32_0 = arith.constant 0 : i32
    %c0_i32_1 = arith.constant 0 : i32
    return %arg0, %c0_i32, %c0_i32_0 : i32, i32, i32
  }
  func.func @transform_3(%arg0: i32, %arg1: i32) -> (i32, i32, i32) {
    %c0_i32 = arith.constant 0 : i32
    %c0_i32_0 = arith.constant 0 : i32
    return %arg0, %c0_i32, %arg1 : i32, i32, i32
  }
  func.func @transform_4(%arg0: i32, %arg1: i32) -> i32 {
    %c0_i32 = arith.constant 0 : i32
    %c0_i32_0 = arith.constant 0 : i32
    return %c0_i32 : i32
  }
  func.func @transform_5(%arg0: i32, %arg1: i32) -> (i32, i32, i32) {
    %c0_i32 = arith.constant 0 : i32
    %c0_i32_0 = arith.constant 0 : i32
    return %arg0, %c0_i32, %arg1 : i32, i32, i32
  }
  func.func @transform_6(%arg0: i32, %arg1: i32) -> (i32, i32, i32) {
    %c0_i32 = arith.constant 0 : i32
    %c0_i32_0 = arith.constant 0 : i32
    return %arg0, %arg1, %c0_i32 : i32, i32, i32
  }
}

</mosaic_0001>

<bundles_post_ra>
// kernel: tpu_custom_call.1
= control target key start
LH: loop header
LB: loop body
LE: loop exit
PB: predicated region body
PF: predicated region fallthrough
CT: control target
= control target key end

     0   :  { %s3113_s0 = inlined_call_operand.vmem [shape: bf16[2,256,2], index: 0, kind: input, shape index: {}]   ;;  %s3114_s1 = inlined_call_operand.vmem [shape: bf16[2,2,256], index: 1, kind: input, shape index: {}]   ;;  %s3115_s2 = inlined_call_operand.vmem [shape: bf16[2,16,256], index: 2, kind: input, shape index: {}]   ;;  %s3116_s3 = inlined_call_operand.vmem [shape: f32[2,16,256], index: 3, kind: input, shape index: {}]   ;;  %s3117_s4 = inlined_call_operand.<no memory space> [shape: f32[1], index: 4, kind: input, shape index: {}]   ;;  %s3118_s5 = inlined_call_operand.hbm [shape: f32[2,16,256], index: 5, kind: output, shape index: {0}]   ;;  %s3119_s6 = inlined_call_operand.hbm [shape: bf16[2,256,256], index: 6, kind: output, shape index: {1}]  }
   0x1   :  { %12 = sst [smem:[#allocation2]] %s3117_s4 }
   0x2   :  { %13 = vsyncpa [#allocation4], 0 }
   0x3   :  { %15 = vsyncpa [#allocation4 + $0x1], 0 }
   0x4   :  { %16 = vsyncpa [#allocation6], 0 }
   0x5   :  { %18 = vsyncpa [#allocation6 + $0x1], 0  ;;  %s2322_s23 = smov 0   ;;  %s2324_s24 = smov 0  }
   0x6   :  { %s2326_s25 = smov 0   ;;  %s2328_s26 = smov 0  }
   0x7   :  { %s2330_s27 = smov 0   ;;  %s2332_s28 = smov 0  }
   0x8 LB: > { %s1760_s4 = sadd.s32 4294967295, %s2274_s28   ;;  %s1761_s29 = sadd.s32 4294967294, %s2274_s28   ;;  %s2274_s28 = sphi %s2332_s28, %s24_s28   ;;  %s2270_s27 = sphi %s2330_s27, %s3212_s27   ;;  %s2266_s26 = sphi %s2328_s26, %s3211_s26   ;;  %s2262_s25 = sphi %s2326_s25, %s3210_s25   ;;  %s2258_s24 = sphi %s2324_s24, %s3209_s24   ;;  %s2254_s23 = sphi %s2322_s23, %s3208_s23  }
   0x9   : > { %s36_s30 = sadd.s32 1, %s2270_s27  ;;  %s174_s7 = sadd.s32 1, %s2262_s25 }
   0xa   : > { %p38_p0 = scmp.ge.s32.totalorder %s36_s30, 2  ;;  %p184_p1 = scmp.ne.s32.totalorder %s2262_s25, %s2258_s24 }
   0xb   : > { %p185_p2 = scmp.eq.s32.totalorder %s1760_s4, 1  ;;  %p190_p3 = scmp.ne.s32.totalorder %s2258_s24, %s2254_s23 }
   0xc   : > { %s3214_s30 = smov (%p38_p0, %s36_s30), 0  ;;  %p191_p5 = scmp.eq.s32.totalorder %s1761_s29, 1 }
   0xd   : > { %p2362_p4 = por %p185_p2, %p184_p1  ;;  %s169_s9 = ssub.s32 %s2270_s27, %s3214_s30 }
   0xe   : > { %p1764_p6 = scmp.ge.s32.totalorder %s2274_s28, 1  ;;  %p172_p7 = scmp.eq.s32.totalorder %s169_s9, 0 }
   0xf   : > { %p2369_p8 = por %p191_p5, %p190_p3  ;;  %p281_p9 = scmp.lt.s32.totalorder %s2274_s28, 3 }
  0x10   : > { %s2375_s11 = scalar_select %p172_p7, %s2262_s25, %s174_s7  }
  0x11   : > { %p282_p10 = pnand %p1764_p6, %p281_p9 }
  0x13   : > { %285 = sbr.rel (%p282_p10) target bundleno = 1007 (0x3ef), region = 40 }
  0x1a   : > { %p339_p11 = scmp.lt.s32.totalorder %s2266_s26, 1  ;;  %v496_v0 = vlaneseq  ;;  %v2276_v1 = vmov 1966171168   ;;  %v2277_v3 = vmov 0   ;;  %vm556_vm0 = vcmask 1040384   ;;  %s2850_s21 = sand.u32 1, %s2258_s24  }
  0x1b   : > { %v494_v2 = vunpack.c.l.s4 %v2276_v1  ;;  %595 = vmatprep.mubr.bf16.mxu0 %v2277_v3  ;;  %vm507_vm1 = vcmask 15360   ;;  %s1766_s22 = sshll.u32 %s2850_s21, 8  ;;  %s1570_s19 = scalar_lea.sflag [#allocation6], %s2850_s21 }
  0x1c   : > { %s2380_s12 = scalar_select %p339_p11, %s2266_s26, 1  ;;  %v497_v4 = vshrl.u32 %v496_v0, 7 }
  0x1d   : > { %v495_v5 = vunpack.c.0.s8 %v494_v2  ;;  %s2861_s4 = scalar_lea.vmem [#allocation5], %s1766_s22  ;;  %s2278_s22 = smov [#allocation5]  }
  0x1e   : > { %s1850_s13 = sshll.u32 %s2380_s12, 7  ;;  %s1769_s14 = sshll.u32 %s2380_s12, 1 }
  0x1f   : > { %s2387_s17 = scalar_lea.vmem %s3113_s0, %s1850_s13  ;;  %s351_s20 = scalar_lea.vmem %s3114_s1, %s1769_s14  ;;  %v498_v6 = vsub.s32 %v495_v5, %v497_v4 }
  0x20   : > { %v1790_v7 = vld.sshfl [vmem:[%s351_s20] sm:$0x11 pattern:$0x75316420]  ;;  %v1954_v13 = vld [vmem:[%s2387_s17 + $0x8] sm:$0xff]   ;;  %v1955_v14 = vld [vmem:[%s2387_s17 + $0x10] sm:$0xff]  }
  0x21   : > { %v492_v8 = vcombine.high %v1790_v7, %v1790_v7  ;;  %v499_v9 = vrot.slane %v1790_v7, %v498_v6  ;;  %v1953_v12 = vld [vmem:[%s2387_s17] sm:$0xff]   ;;  %v1956_v15 = vld [vmem:[%s2387_s17 + $0x18] sm:$0xff]   ;;  %v1958_v17 = vld [vmem:[%s2387_s17 + $0x28] sm:$0xff]   ;;  %s1851_s29 = sshll.u32 %s2380_s12, 4  ;;  %s1886_s14 = sshll.u32 %s2266_s26, 12 }
  0x22   : > { %v1957_v16 = vld [vmem:[%s2387_s17 + $0x20] sm:$0xff]   ;;  %v1959_v18 = vld [vmem:[%s2387_s17 + $0x30] sm:$0xff]   ;;  %v1960_v19 = vld [vmem:[%s2387_s17 + $0x38] sm:$0xff]   ;;  %s2974_s13 = scalar_lea.vmem %s3115_s2, %s1851_s29  ;;  %s1604_s15 = sshll.u32 %s2861_s4, 4  ;;  %s3028_s15 = int_to_ptr.vmem [resolvable:$true] %s1604_s15 }
  0x23   : > { %v506_v10 = vrot.slane %v492_v8, %v498_v6  ;;  %v558_v11 = vsel %vm556_vm0, %v499_v9, 0  ;;  %v1961_v20 = vld [vmem:[%s2387_s17 + $0x40] sm:$0xff]   ;;  %v1962_v21 = vld [vmem:[%s2387_s17 + $0x48] sm:$0xff]   ;;  %v1963_v22 = vld [vmem:[%s2387_s17 + $0x50] sm:$0xff]   ;;  %s3026_s18 = scalar_lea.hbm %s3119_s6, %s1886_s14  ;;  %s2164_s20 = scalar_lea.vmem %s3028_s15, 4096 }
  0x24   : > { %v1964_v23 = vld [vmem:[%s2387_s17 + $0x58] sm:$0xff]   ;;  %v1965_v24 = vld [vmem:[%s2387_s17 + $0x60] sm:$0xff]   ;;  %v1966_v25 = vld [vmem:[%s2387_s17 + $0x68] sm:$0xff]   ;;  %p2165_p12 = scmp.ne.s32.totalorder %s3028_s15, %s2164_s20  ;;  %s2168_s29 = sshll.u32 %s2278_s22, 4  ;;  %s2169_s29 = int_to_ptr.vmem [resolvable:$false] %s2168_s29 }
  0x25   : > { %1791 = vmatprep.subr.msk.bf16.mxu0 %vm556_vm0, %v506_v10  ;;  %v1967_v26 = vld [vmem:[%s2387_s17 + $0x70] sm:$0xff]   ;;  %v1968_v27 = vld [vmem:[%s2387_s17 + $0x78] sm:$0xff]   ;;  %p2171_p1 = scmp.lt.s32.totalorder %s3028_s15, %s2169_s29 }
  0x26   : > { %564 = vmatpush1.bf16.msra.mxu0 %v558_v11  ;;  %p2166_p13 = pnand %p2165_p12, %p2362_p4 }
  0x28   : > { %p2167_p0 = pneg %p2166_p13 }
  0x29   : > { %1792 = vmatmul.mubr.msk.bf16.vlgmr.msra.gmra.mrb[0].mxu0 %vm507_vm1, %v1953_v12 }
  0x2a   : > { %605 = vmatprep.mubr.bf16.mxu0 %v2277_v3 }
  0x31   : > { %1793 = vmatmul.mubr.msk.bf16.gmra.mrb[4].mxu0 %vm507_vm1, %v1954_v13 }
  0x32   : > { %615 = vmatprep.mubr.bf16.mxu0 %v2277_v3 }
  0x39   : > { %1794 = vmatmul.mubr.msk.bf16.gmra.mrb[8].mxu0 %vm507_vm1, %v1955_v14 }
  0x3a   : > { %625 = vmatprep.mubr.bf16.mxu0 %v2277_v3 }
  0x41   : > { %1795 = vmatmul.mubr.msk.bf16.gmra.mrb[12].mxu0 %vm507_vm1, %v1956_v15 }
  0x42   : > { %635 = vmatprep.mubr.bf16.mxu0 %v2277_v3 }
  0x49   : > { %1796 = vmatmul.mubr.msk.bf16.gmra.mrb[16].mxu0 %vm507_vm1, %v1957_v16 }
  0x4a   : > { %645 = vmatprep.mubr.bf16.mxu0 %v2277_v3 }
  0x51   : > { %1797 = vmatmul.mubr.msk.bf16.gmra.mrb[20].mxu0 %vm507_vm1, %v1958_v17 }
  0x52   : > { %655 = vmatprep.mubr.bf16.mxu0 %v2277_v3 }
  0x59   : > { %1798 = vmatmul.mubr.msk.bf16.gmra.mrb[24].mxu0 %vm507_vm1, %v1959_v18 }
  0x5a   : > { %665 = vmatprep.mubr.bf16.mxu0 %v2277_v3 }
  0x61   : > { %1799 = vmatmul.mubr.msk.bf16.gmra.mrb[28].mxu0 %vm507_vm1, %v1960_v19 }
  0x62   : > { %675 = vmatprep.mubr.bf16.mxu0 %v2277_v3 }
  0x69   : > { %1800 = vmatmul.mubr.msk.bf16.gmra.mrb[32].mxu0 %vm507_vm1, %v1961_v20 }
  0x6a   : > { %685 = vmatprep.mubr.bf16.mxu0 %v2277_v3 }
  0x71   : > { %1801 = vmatmul.mubr.msk.bf16.gmra.mrb[36].mxu0 %vm507_vm1, %v1962_v21 }
  0x72   : > { %695 = vmatprep.mubr.bf16.mxu0 %v2277_v3 }
  0x79   : > { %1802 = vmatmul.mubr.msk.bf16.gmra.mrb[40].mxu0 %vm507_vm1, %v1963_v22 }
  0x7a   : > { %705 = vmatprep.mubr.bf16.mxu0 %v2277_v3 }
  0x81   : > { %1803 = vmatmul.mubr.msk.bf16.gmra.mrb[44].mxu0 %vm507_vm1, %v1964_v23 }
  0x82   : > { %715 = vmatprep.mubr.bf16.mxu0 %v2277_v3 }
  0x89   : > { %1804 = vmatmul.mubr.msk.bf16.gmra.mrb[48].mxu0 %vm507_vm1, %v1965_v24 }
  0x8a   : > { %725 = vmatprep.mubr.bf16.mxu0 %v2277_v3 }
  0x91   : > { %1805 = vmatmul.mubr.msk.bf16.gmra.mrb[52].mxu0 %vm507_vm1, %v1966_v25 }
  0x92   : > { %735 = vmatprep.mubr.bf16.mxu0 %v2277_v3 }
  0x99   : > { %1806 = vmatmul.mubr.msk.bf16.gmra.mrb[56].mxu0 %vm507_vm1, %v1967_v26 }
  0x9a   : > { %745 = vmatprep.mubr.bf16.mxu0 %v2277_v3 }
  0xa1   : > { %1807 = vmatmul.mubr.msk.bf16.gmra.mrb[60].mxu0 %vm507_vm1, %v1968_v27 }
  0xfc   : > { %v2439_v28 = vpop.f32.mrb[0].mxu0 }
  0xfd   : > { %v2441_v29 = vpop.f32.mrb[1].mxu0 }
  0xfe   : > { %v2443_v30 = vpop.f32.mrb[2].mxu0  ;;  %v756_v31 = vmax.f32 %v2439_v28, %v2441_v29 }
  0xff   : > { %v2447_v32 = vpop.f32.mrb[3].mxu0 }
 0x100   : > { %757 = vmax.xlane.f32.xlu0 %v756_v31  ;;  %v759_v33 = vmax.f32 %v2443_v30, %v2447_v32 }
 0x104   : > { %760 = vmax.xlane.f32.xlu0 %v759_v33  ;;  %v2451_v34 = vpop.f32.mrb[4].mxu0 }
 0x105   : > { %v2453_v35 = vpop.f32.mrb[5].mxu0 }
 0x106   : > { %v2455_v36 = vpop.f32.mrb[6].mxu0  ;;  %v762_v37 = vmax.f32 %v2451_v34, %v2453_v35 }
 0x107   : > { %v2459_v38 = vpop.f32.mrb[7].mxu0 }
 0x108   : > { %763 = vmax.xlane.f32.xlu1 %v762_v37  ;;  %v765_v39 = vmax.f32 %v2455_v36, %v2459_v38 }
 0x10c   : > { %766 = vmax.xlane.f32.xlu1 %v765_v39  ;;  %v2463_v40 = vpop.f32.mrb[8].mxu0 }
 0x10d   : > { %v2465_v41 = vpop.f32.mrb[9].mxu0 }
 0x10e   : > { %v2467_v42 = vpop.f32.mrb[10].mxu0  ;;  %v768_v43 = vmax.f32 %v2463_v40, %v2465_v41 }
 0x10f   : > { %v2471_v44 = vpop.f32.mrb[11].mxu0 }
 0x110   : > { %769 = vmax.xlane.f32.xlu0 %v768_v43  ;;  %v771_v45 = vmax.f32 %v2467_v42, %v2471_v44 }
 0x112   : > { %772 = vmax.xlane.f32.xlu1 %v771_v45 }
 0x114   : > { %v2475_v46 = vpop.f32.mrb[12].mxu0 }
 0x115   : > { %v2477_v47 = vpop.f32.mrb[13].mxu0 }
 0x116   : > { %v2479_v48 = vpop.f32.mrb[14].mxu0  ;;  %v774_v49 = vmax.f32 %v2475_v46, %v2477_v47 }
 0x117   : > { %v2483_v50 = vpop.f32.mrb[15].mxu0 }
 0x118   : > { %775 = vmax.xlane.f32.xlu0 %v774_v49  ;;  %v777_v51 = vmax.f32 %v2479_v48, %v2483_v50 }
 0x11a   : > { %778 = vmax.xlane.f32.xlu1 %v777_v51 }
 0x11c   : > { %v2487_v52 = vpop.f32.mrb[16].mxu0 }
 0x11d   : > { %v2489_v53 = vpop.f32.mrb[17].mxu0 }
 0x11e   : > { %v2491_v54 = vpop.f32.mrb[18].mxu0  ;;  %v780_v55 = vmax.f32 %v2487_v52, %v2489_v53 }
 0x11f   : > { %v2495_v56 = vpop.f32.mrb[19].mxu0 }
 0x120   : > { %781 = vmax.xlane.f32.xlu0 %v780_v55  ;;  %v783_v57 = vmax.f32 %v2491_v54, %v2495_v56 }
 0x122   : > { %784 = vmax.xlane.f32.xlu1 %v783_v57 }
 0x124   : > { %v2499_v58 = vpop.f32.mrb[20].mxu0 }
 0x125   : > { %v2501_v59 = vpop.f32.mrb[21].mxu0 }
 0x126   : > { %v2503_v60 = vpop.f32.mrb[22].mxu0  ;;  %v786_v61 = vmax.f32 %v2499_v58, %v2501_v59 }
 0x127   : > { %v2507_v62 = vpop.f32.mrb[23].mxu0 }
 0x128   : > { %787 = vmax.xlane.f32.xlu0 %v786_v61  ;;  %v789_v63 = vmax.f32 %v2503_v60, %v2507_v62 }
 0x12a   : > { %790 = vmax.xlane.f32.xlu1 %v789_v63 }
 0x12c   : > { %v2511_v0 = vpop.f32.mrb[24].mxu0 }
 0x12d   : > { %v2513_v1 = vpop.f32.mrb[25].mxu0 }
 0x12e   : > { %v2515_v2 = vpop.f32.mrb[26].mxu0  ;;  %v792_v3 = vmax.f32 %v2511_v0, %v2513_v1 }
 0x12f   : > { %v2519_v4 = vpop.f32.mrb[27].mxu0 }
 0x130   : > { %793 = vmax.xlane.f32.xlu0 %v792_v3  ;;  %v795_v5 = vmax.f32 %v2515_v2, %v2519_v4 }
 0x132   : > { %796 = vmax.xlane.f32.xlu1 %v795_v5 }
 0x134   : > { %v2523_v6 = vpop.f32.mrb[28].mxu0 }
 0x135   : > { %v2525_v7 = vpop.f32.mrb[29].mxu0 }
 0x136   : > { %v2527_v8 = vpop.f32.mrb[30].mxu0  ;;  %v798_v9 = vmax.f32 %v2523_v6, %v2525_v7 }
 0x137   : > { %v2531_v10 = vpop.f32.mrb[31].mxu0 }
 0x138   : > { %799 = vmax.xlane.f32.xlu0 %v798_v9  ;;  %v801_v11 = vmax.f32 %v2527_v8, %v2531_v10 }
 0x13a   : > { %802 = vmax.xlane.f32.xlu1 %v801_v11 }
 0x13c   : > { %v2535_v12 = vpop.f32.mrb[32].mxu0 }
 0x13d   : > { %v2537_v13 = vpop.f32.mrb[33].mxu0 }
 0x13e   : > { %v2539_v14 = vpop.f32.mrb[34].mxu0  ;;  %v804_v15 = vmax.f32 %v2535_v12, %v2537_v13 }
 0x13f   : > { %v2543_v16 = vpop.f32.mrb[35].mxu0 }
 0x140   : > { %3148 = vst [vmem:[#allocation9_spill] sm:$0xff] %v2543_v16  ;;  %805 = vmax.xlane.f32.xlu0 %v804_v15  ;;  %v807_v17 = vmax.f32 %v2539_v14, %v2543_v16 }
 0x142   : > { %808 = vmax.xlane.f32.xlu1 %v807_v17 }
 0x144   : > { %v2547_v18 = vpop.f32.mrb[36].mxu0 }
 0x145   : > { %3149 = vst [vmem:[#allocation10_spill] sm:$0xff] %v2547_v18  ;;  %v2549_v19 = vpop.f32.mrb[37].mxu0 }
 0x146   : > { %3150 = vst [vmem:[#allocation11_spill] sm:$0xff] %v2549_v19  ;;  %v2551_v20 = vpop.f32.mrb[38].mxu0  ;;  %v810_v21 = vmax.f32 %v2547_v18, %v2549_v19 }
 0x147   : > { %3151 = vst [vmem:[#allocation12_spill] sm:$0xff] %v2551_v20  ;;  %v2555_v22 = vpop.f32.mrb[39].mxu0 }
 0x148   : > { %3152 = vst [vmem:[#allocation13_spill] sm:$0xff] %v2555_v22  ;;  %811 = vmax.xlane.f32.xlu0 %v810_v21  ;;  %v813_v23 = vmax.f32 %v2551_v20, %v2555_v22 }
 0x14a   : > { %814 = vmax.xlane.f32.xlu1 %v813_v23 }
 0x14c   : > { %v2559_v24 = vpop.f32.mrb[40].mxu0 }
 0x14d   : > { %3153 = vst [vmem:[#allocation14_spill] sm:$0xff] %v2559_v24  ;;  %v2561_v25 = vpop.f32.mrb[41].mxu0 }
 0x14e   : > { %3154 = vst [vmem:[#allocation15_spill] sm:$0xff] %v2561_v25  ;;  %v2563_v26 = vpop.f32.mrb[42].mxu0  ;;  %v816_v27 = vmax.f32 %v2559_v24, %v2561_v25 }
 0x14f   : > { %3155 = vst [vmem:[#allocation16_spill] sm:$0xff] %v2563_v26  ;;  %v2567_v31 = vpop.f32.mrb[43].mxu0 }
 0x150   : > { %3156 = vst [vmem:[#allocation17_spill] sm:$0xff] %v2567_v31  ;;  %817 = vmax.xlane.f32.xlu0 %v816_v27  ;;  %v819_v33 = vmax.f32 %v2563_v26, %v2567_v31 }
 0x152   : > { %820 = vmax.xlane.f32.xlu1 %v819_v33 }
 0x154   : > { %v2571_v37 = vpop.f32.mrb[44].mxu0 }
 0x155   : > { %3157 = vst [vmem:[#allocation18_spill] sm:$0xff] %v2571_v37  ;;  %v2573_v39 = vpop.f32.mrb[45].mxu0 }
 0x156   : > { %3158 = vst [vmem:[#allocation19_spill] sm:$0xff] %v2573_v39  ;;  %v2575_v43 = vpop.f32.mrb[46].mxu0  ;;  %v822_v45 = vmax.f32 %v2571_v37, %v2573_v39 }
 0x157   : > { %3159 = vst [vmem:[#allocation20_spill] sm:$0xff] %v2575_v43  ;;  %v2579_v49 = vpop.f32.mrb[47].mxu0 }
 0x158   : > { %3160 = vst [vmem:[#allocation21_spill] sm:$0xff] %v2579_v49  ;;  %823 = vmax.xlane.f32.xlu0 %v822_v45  ;;  %v825_v51 = vmax.f32 %v2575_v43, %v2579_v49 }
 0x15a   : > { %826 = vmax.xlane.f32.xlu1 %v825_v51 }
 0x15c   : > { %v2583_v55 = vpop.f32.mrb[48].mxu0 }
 0x15d   : > { %v2585_v57 = vpop.f32.mrb[49].mxu0 }
 0x15e   : > { %v2587_v61 = vpop.f32.mrb[50].mxu0 }
 0x15f   : > { %v2591_v3 = vpop.f32.mrb[51].mxu0 }
 0x164   : > { %v2595_v9 = vpop.f32.mrb[52].mxu0 }
 0x165   : > { %v2597_v11 = vpop.f32.mrb[53].mxu0 }
 0x166   : > { %v2599_v15 = vpop.f32.mrb[54].mxu0 }
 0x167   : > { %v2603_v21 = vpop.f32.mrb[55].mxu0 }
 0x16c   : > { %v2607_v27 = vpop.f32.mrb[56].mxu0 }
 0x16d   : > { %v2609_v33 = vpop.f32.mrb[57].mxu0 }
 0x16e   : > { %v2611_v45 = vpop.f32.mrb[58].mxu0 }
 0x16f   : > { %v2615_v5 = vpop.f32.mrb[59].mxu0 }
 0x174   : > { %v2619_v17 = vpop.f32.mrb[60].mxu0 }
 0x175   : > { %v2621_v49 = vpop.f32.mrb[61].mxu0 }
 0x176   : > { %v2623_v43 = vpop.f32.mrb[62].mxu0 }
 0x177   : > { %v2627_v39 = vpop.f32.mrb[63].mxu0 }
 0x18d   : > { %v758_v51 = vpop.xlane.xlu0 %757 }
 0x18e   : > { %v852_v31 = vsub.f32 %v2439_v28, %v758_v51  ;;  %v853_v26 = vsub.f32 %v2441_v29, %v758_v51 }
 0x190   : > { %v916_v63 = vmul.f32 1.442695, %v852_v31  ;;  %v918_v25 = vmul.f32 1.442695, %v853_v26 }
 0x191   : > { %v761_v24 = vpop.xlane.xlu0 %760 }
 0x192   : > { %1972 = vpow2.f32 %v916_v63  ;;  %v854_v22 = vsub.f32 %v2443_v30, %v761_v24  ;;  %v855_v20 = vsub.f32 %v2447_v32, %v761_v24 }
 0x193   : > { %1974 = vpow2.f32 %v918_v25 }
 0x194   : > { %v920_v23 = vmul.f32 1.442695, %v854_v22  ;;  %v922_v19 = vmul.f32 1.442695, %v855_v20 }
 0x195   : > { %v764_v18 = vpop.xlane.xlu1 %763 }
 0x196   : > { %1976 = vpow2.f32 %v920_v23  ;;  %v856_v37 = vsub.f32 %v2451_v34, %v764_v18  ;;  %v857_v16 = vsub.f32 %v2453_v35, %v764_v18 }
 0x197   : > { %1978 = vpow2.f32 %v922_v19 }
 0x198   : > { %v924_v28 = vmul.f32 1.442695, %v856_v37  ;;  %v926_v29 = vmul.f32 1.442695, %v857_v16 }
 0x199   : > { %v767_v31 = vpop.xlane.xlu1 %766 }
 0x19a   : > { %1980 = vpow2.f32 %v924_v28  ;;  %v858_v26 = vsub.f32 %v2455_v36, %v767_v31  ;;  %v859_v30 = vsub.f32 %v2459_v38, %v767_v31 }
 0x19b   : > { %1982 = vpow2.f32 %v926_v29  ;;  %v3161_v29 = vmax.f32 %v2583_v55, %v2585_v57 }
 0x19c   : > { %v2639_v32 = vpop.eup %1972  ;;  %v928_v22 = vmul.f32 1.442695, %v858_v26  ;;  %v930_v20 = vmul.f32 1.442695, %v859_v30 }
 0x19d   : > { %v2641_v24 = vpop.eup %1974  ;;  %v770_v25 = vpop.xlane.xlu0 %769 }
 0x19e   : > { %1984 = vpow2.f32 %v928_v22  ;;  %v860_v34 = vsub.f32 %v2463_v40, %v770_v25  ;;  %v861_v35 = vsub.f32 %v2465_v41, %v770_v25  ;;  %v1050_v16 = vadd.f32 %v2641_v24, %v2639_v32 }
 0x19f   : > { %1986 = vpow2.f32 %v930_v20  ;;  %v773_v36 = vpop.xlane.xlu1 %772 }
 0x1a0   : > { %v2647_v18 = vpop.eup %1976  ;;  %v932_v38 = vmul.f32 1.442695, %v860_v34  ;;  %v934_v19 = vmul.f32 1.442695, %v861_v35  ;;  %v862_v37 = vsub.f32 %v2467_v42, %v773_v36  ;;  %v863_v63 = vsub.f32 %v2471_v44, %v773_v36  ;;  %1051 = vadd.xlane.f32.xlu0 %v1050_v16 }
 0x1a1   : > { %v2651_v23 = vpop.eup %1978  ;;  %v3162_v36 = vmax.f32 %v2587_v61, %v2591_v3 }
 0x1a2   : > { %1988 = vpow2.f32 %v932_v38  ;;  %v936_v40 = vmul.f32 1.442695, %v862_v37  ;;  %v938_v51 = vmul.f32 1.442695, %v863_v63  ;;  %v1053_v41 = vadd.f32 %v2651_v23, %v2647_v18 }
 0x1a3   : > { %1990 = vpow2.f32 %v934_v19 }
 0x1a4   : > { %v2655_v28 = vpop.eup %1980  ;;  %1992 = vpow2.f32 %v936_v40  ;;  %1054 = vadd.xlane.f32.xlu1 %v1053_v41  ;;  %829 = vmax.xlane.f32.xlu0 %v3161_v29 }
 0x1a5   : > { %v2660_v42 = vpop.eup %1982  ;;  %1994 = vpow2.f32 %v938_v51  ;;  %v776_v44 = vpop.xlane.xlu0 %775 }
 0x1a6   : > { %v864_v31 = vsub.f32 %v2475_v46, %v776_v44  ;;  %v865_v26 = vsub.f32 %v2477_v47, %v776_v44  ;;  %v1056_v30 = vadd.f32 %v2660_v42, %v2655_v28 }
 0x1a7   : > { %v779_v22 = vpop.xlane.xlu1 %778 }
 0x1a8   : > { %v2666_v20 = vpop.eup %1984  ;;  %v940_v25 = vmul.f32 1.442695, %v864_v31  ;;  %v942_v34 = vmul.f32 1.442695, %v865_v26  ;;  %v866_v35 = vsub.f32 %v2479_v48, %v779_v22  ;;  %v867_v16 = vsub.f32 %v2483_v50, %v779_v22  ;;  %1057 = vadd.xlane.f32.xlu0 %v1056_v30  ;;  %832 = vmax.xlane.f32.xlu1 %v3162_v36 }
 0x1a9   : > { %v2673_v46 = vpop.eup %1986  ;;  %v3163_v48 = vmax.f32 %v2595_v9, %v2597_v11 }
 0x1aa   : > { %1996 = vpow2.f32 %v940_v25  ;;  %v944_v47 = vmul.f32 1.442695, %v866_v35  ;;  %v946_v38 = vmul.f32 1.442695, %v867_v16  ;;  %v1059_v19 = vadd.f32 %v2673_v46, %v2666_v20 }
 0x1ab   : > { %1998 = vpow2.f32 %v942_v34  ;;  %v3164_v34 = vmax.f32 %v2599_v15, %v2603_v21 }
 0x1ac   : > { %v2677_v37 = vpop.eup %1988  ;;  %2000 = vpow2.f32 %v944_v47  ;;  %1060 = vadd.xlane.f32.xlu1 %v1059_v19  ;;  %835 = vmax.xlane.f32.xlu0 %v3163_v48 }
 0x1ad   : > { %v2682_v50 = vpop.eup %1990  ;;  %2002 = vpow2.f32 %v946_v38  ;;  %v782_v63 = vpop.xlane.xlu0 %781 }
 0x1ae   : > { %v2684_v40 = vpop.eup %1992  ;;  %v868_v51 = vsub.f32 %v2487_v52, %v782_v63  ;;  %v869_v41 = vsub.f32 %v2489_v53, %v782_v63  ;;  %v1062_v29 = vadd.f32 %v2682_v50, %v2677_v37 }
 0x1af   : > { %v2690_v44 = vpop.eup %1994  ;;  %v785_v31 = vpop.xlane.xlu1 %784 }
 0x1b0   : > { %v948_v26 = vmul.f32 1.442695, %v868_v51  ;;  %v950_v30 = vmul.f32 1.442695, %v869_v41  ;;  %v870_v22 = vsub.f32 %v2491_v54, %v785_v31  ;;  %v871_v25 = vsub.f32 %v2495_v56, %v785_v31  ;;  %1063 = vadd.xlane.f32.xlu0 %v1062_v29  ;;  %838 = vmax.xlane.f32.xlu1 %v3164_v34 }
 0x1b1   : > { %v1065_v35 = vadd.f32 %v2690_v44, %v2684_v40  ;;  %v3165_v54 = vmax.f32 %v2607_v27, %v2609_v33 }
 0x1b2   : > { %2004 = vpow2.f32 %v948_v26  ;;  %v952_v52 = vmul.f32 1.442695, %v870_v22  ;;  %v954_v53 = vmul.f32 1.442695, %v871_v25 }
 0x1b3   : > { %2006 = vpow2.f32 %v950_v30  ;;  %v3166_v30 = vmax.f32 %v2611_v45, %v2615_v5 }
 0x1b4   : > { %v2699_v16 = vpop.eup %1996  ;;  %2008 = vpow2.f32 %v952_v52  ;;  %1066 = vadd.xlane.f32.xlu1 %v1065_v35  ;;  %841 = vmax.xlane.f32.xlu0 %v3165_v54 }
 0x1b5   : > { %v2704_v56 = vpop.eup %1998  ;;  %2010 = vpow2.f32 %v954_v53  ;;  %v788_v36 = vpop.xlane.xlu0 %787 }
 0x1b6   : > { %v2706_v47 = vpop.eup %2000  ;;  %v872_v38 = vsub.f32 %v2499_v58, %v788_v36  ;;  %v873_v19 = vsub.f32 %v2501_v59, %v788_v36  ;;  %v1068_v48 = vadd.f32 %v2704_v56, %v2699_v16 }
 0x1b7   : > { %v2712_v63 = vpop.eup %2002  ;;  %v791_v51 = vpop.xlane.xlu1 %790 }
 0x1b8   : > { %v956_v41 = vmul.f32 1.442695, %v872_v38  ;;  %v958_v29 = vmul.f32 1.442695, %v873_v19  ;;  %v874_v31 = vsub.f32 %v2503_v60, %v791_v51  ;;  %v875_v26 = vsub.f32 %v2507_v62, %v791_v51  ;;  %1069 = vadd.xlane.f32.xlu0 %v1068_v48  ;;  %844 = vmax.xlane.f32.xlu1 %v3166_v30 }
 0x1b9   : > { %v1071_v22 = vadd.f32 %v2712_v63, %v2706_v47  ;;  %v3167_v60 = vmax.f32 %v2619_v17, %v2621_v49 }
 0x1ba   : > { %2012 = vpow2.f32 %v956_v41  ;;  %v960_v58 = vmul.f32 1.442695, %v874_v31  ;;  %v962_v59 = vmul.f32 1.442695, %v875_v26 }
 0x1bb   : > { %2014 = vpow2.f32 %v958_v29  ;;  %v3168_v29 = vmax.f32 %v2623_v43, %v2627_v39 }
 0x1bc   : > { %v2721_v25 = vpop.eup %2004  ;;  %2016 = vpow2.f32 %v960_v58  ;;  %1072 = vadd.xlane.f32.xlu1 %v1071_v22  ;;  %847 = vmax.xlane.f32.xlu0 %v3167_v60 }
 0x1bd   : > { %v2726_v62 = vpop.eup %2006  ;;  %2018 = vpow2.f32 %v962_v59  ;;  %v794_v34 = vpop.xlane.xlu0 %793 }
 0x1be   : > { %v2728_v52 = vpop.eup %2008  ;;  %v876_v53 = vsub.f32 %v2511_v0, %v794_v34  ;;  %v877_v35 = vsub.f32 %v2513_v1, %v794_v34  ;;  %v1074_v54 = vadd.f32 %v2726_v62, %v2721_v25 }
 0x1bf   : > { %v2734_v36 = vpop.eup %2010  ;;  %v797_v38 = vpop.xlane.xlu1 %796 }
 0x1c0   : > { %v964_v19 = vmul.f32 1.442695, %v876_v53  ;;  %v966_v48 = vmul.f32 1.442695, %v877_v35  ;;  %v878_v51 = vsub.f32 %v2515_v2, %v797_v38  ;;  %v879_v41 = vsub.f32 %v2519_v4, %v797_v38  ;;  %1075 = vadd.xlane.f32.xlu0 %v1074_v54  ;;  %850 = vmax.xlane.f32.xlu1 %v3168_v29 }
 0x1c1   : > { %v1077_v31 = vadd.f32 %v2734_v36, %v2728_v52 }
 0x1c2   : > { %2020 = vpow2.f32 %v964_v19  ;;  %v968_v0 = vmul.f32 1.442695, %v878_v51  ;;  %v970_v1 = vmul.f32 1.442695, %v879_v41 }
 0x1c3   : > { %2022 = vpow2.f32 %v966_v48 }
 0x1c4   : > { %v2743_v26 = vpop.eup %2012  ;;  %2024 = vpow2.f32 %v968_v0  ;;  %1078 = vadd.xlane.f32.xlu1 %v1077_v31 }
 0x1c5   : > { %v2745_v30 = vpop.eup %2014  ;;  %2026 = vpow2.f32 %v970_v1  ;;  %v800_v2 = vpop.xlane.xlu0 %799 }
 0x1c6   : > { %v2747_v4 = vpop.eup %2016  ;;  %v880_v58 = vsub.f32 %v2523_v6, %v800_v2  ;;  %v881_v59 = vsub.f32 %v2525_v7, %v800_v2  ;;  %v1080_v22 = vadd.f32 %v2745_v30, %v2743_v26 }
 0x1c7   : > { %v2753_v60 = vpop.eup %2018  ;;  %v803_v34 = vpop.xlane.xlu1 %802 }
 0x1c8   : > { %v972_v53 = vmul.f32 1.442695, %v880_v58  ;;  %v974_v35 = vmul.f32 1.442695, %v881_v59  ;;  %v882_v54 = vsub.f32 %v2527_v8, %v803_v34  ;;  %v883_v38 = vsub.f32 %v2531_v10, %v803_v34  ;;  %1081 = vadd.xlane.f32.xlu0 %v1080_v22  ;;  %v3169_v22 = vld [vmem:[#allocation9_spill] sm:$0xff] }
 0x1c9   : > { %v1083_v19 = vadd.f32 %v2753_v60, %v2747_v4 }
 0x1ca   : > { %2028 = vpow2.f32 %v972_v53  ;;  %v976_v6 = vmul.f32 1.442695, %v882_v54  ;;  %v978_v48 = vmul.f32 1.442695, %v883_v38 }
 0x1cb   : > { %2030 = vpow2.f32 %v974_v35  ;;  %1084 = vadd.xlane.f32.xlu1 %v1083_v19 }
 0x1cc   : > { %v2759_v7 = vpop.eup %2020  ;;  %2032 = vpow2.f32 %v976_v6 }
 0x1cd   : > { %v2761_v51 = vpop.eup %2022  ;;  %2034 = vpow2.f32 %v978_v48  ;;  %v806_v41 = vpop.xlane.xlu0 %805  ;;  %v3173_v48 = vld [vmem:[#allocation11_spill] sm:$0xff] }
 0x1ce   : > { %v2763_v29 = vpop.eup %2024  ;;  %v884_v8 = vsub.f32 %v2535_v12, %v806_v41  ;;  %v885_v10 = vsub.f32 %v2537_v13, %v806_v41  ;;  %v1086_v0 = vadd.f32 %v2761_v51, %v2759_v7 }
 0x1cf   : > { %v2769_v1 = vpop.eup %2026  ;;  %v809_v31 = vpop.xlane.xlu1 %808 }
 0x1d0   : > { %v980_v2 = vmul.f32 1.442695, %v884_v8  ;;  %v982_v58 = vmul.f32 1.442695, %v885_v10  ;;  %v886_v59 = vsub.f32 %v2539_v14, %v809_v31  ;;  %v887_v34 = vsub.f32 %v3169_v22, %v809_v31  ;;  %1087 = vadd.xlane.f32.xlu0 %v1086_v0  ;;  %v3172_v14 = vld [vmem:[#allocation10_spill] sm:$0xff]  ;;  %v3176_v22 = vld [vmem:[#allocation13_spill] sm:$0xff] }
 0x1d1   : > { %v1089_v53 = vadd.f32 %v2769_v1, %v2763_v29 }
 0x1d2   : > { %2036 = vpow2.f32 %v980_v2  ;;  %v984_v12 = vmul.f32 1.442695, %v886_v59  ;;  %v986_v35 = vmul.f32 1.442695, %v887_v34 }
 0x1d3   : > { %2038 = vpow2.f32 %v982_v58  ;;  %1090 = vadd.xlane.f32.xlu1 %v1089_v53  ;;  %v3175_v58 = vld [vmem:[#allocation12_spill] sm:$0xff] }
 0x1d4   : > { %v2775_v13 = vpop.eup %2028  ;;  %2040 = vpow2.f32 %v984_v12 }
 0x1d5   : > { %3170 = vst [vmem:[#allocation9_spill] sm:$0xff] %v2775_v13  ;;  %v2777_v54 = vpop.eup %2030  ;;  %2042 = vpow2.f32 %v986_v35  ;;  %v812_v38 = vpop.xlane.xlu0 %811 }
 0x1d6   : > { %v2779_v19 = vpop.eup %2032  ;;  %v888_v6 = vsub.f32 %v3172_v14, %v812_v38  ;;  %v889_v41 = vsub.f32 %v3173_v48, %v812_v38  ;;  %v1092_v8 = vadd.f32 %v2777_v54, %v2775_v13 }
 0x1d7   : > { %3171 = vst [vmem:[#allocation22_spill] sm:$0xff] %v2779_v19  ;;  %v2785_v10 = vpop.eup %2034  ;;  %v815_v0 = vpop.xlane.xlu1 %814 }
 0x1d8   : > { %3174 = vst [vmem:[#allocation10_spill] sm:$0xff] %v2785_v10  ;;  %v988_v31 = vmul.f32 1.442695, %v888_v6  ;;  %v990_v2 = vmul.f32 1.442695, %v889_v41  ;;  %v890_v59 = vsub.f32 %v3175_v58, %v815_v0  ;;  %v891_v34 = vsub.f32 %v3176_v22, %v815_v0  ;;  %1093 = vadd.xlane.f32.xlu0 %v1092_v8  ;;  %v3180_v41 = vld [vmem:[#allocation14_spill] sm:$0xff] }
 0x1d9   : > { %v1095_v53 = vadd.f32 %v2785_v10, %v2779_v19  ;;  %v3181_v8 = vld [vmem:[#allocation15_spill] sm:$0xff]  ;;  %v3184_v19 = vld [vmem:[#allocation17_spill] sm:$0xff] }
 0x1da   : > { %2044 = vpow2.f32 %v988_v31  ;;  %v992_v12 = vmul.f32 1.442695, %v890_v59  ;;  %v994_v35 = vmul.f32 1.442695, %v891_v34 }
 0x1db   : > { %2046 = vpow2.f32 %v990_v2  ;;  %1096 = vadd.xlane.f32.xlu1 %v1095_v53  ;;  %v3183_v53 = vld [vmem:[#allocation16_spill] sm:$0xff] }
 0x1dc   : > { %v2791_v38 = vpop.eup %2036  ;;  %2048 = vpow2.f32 %v992_v12 }
 0x1dd   : > { %3177 = vst [vmem:[#allocation11_spill] sm:$0xff] %v2791_v38  ;;  %v2793_v14 = vpop.eup %2038  ;;  %2050 = vpow2.f32 %v994_v35  ;;  %v818_v6 = vpop.xlane.xlu0 %817 }
 0x1de   : > { %3178 = vst [vmem:[#allocation12_spill] sm:$0xff] %v2793_v14  ;;  %v2795_v48 = vpop.eup %2040  ;;  %v892_v0 = vsub.f32 %v3180_v41, %v818_v6  ;;  %v893_v58 = vsub.f32 %v3181_v8, %v818_v6  ;;  %v1098_v31 = vadd.f32 %v2793_v14, %v2791_v38 }
 0x1df   : > { %3179 = vst [vmem:[#allocation13_spill] sm:$0xff] %v2795_v48  ;;  %v2801_v59 = vpop.eup %2042  ;;  %v821_v2 = vpop.xlane.xlu1 %820 }
 0x1e0   : > { %3182 = vst [vmem:[#allocation14_spill] sm:$0xff] %v2801_v59  ;;  %v996_v22 = vmul.f32 1.442695, %v892_v0  ;;  %v998_v34 = vmul.f32 1.442695, %v893_v58  ;;  %v894_v12 = vsub.f32 %v3183_v53, %v821_v2  ;;  %v895_v10 = vsub.f32 %v3184_v19, %v821_v2  ;;  %1099 = vadd.xlane.f32.xlu0 %v1098_v31  ;;  %v3185_v53 = vld [vmem:[#allocation18_spill] sm:$0xff] }
 0x1e1   : > { %v1101_v35 = vadd.f32 %v2801_v59, %v2795_v48  ;;  %v3186_v31 = vld [vmem:[#allocation19_spill] sm:$0xff]  ;;  %v3187_v48 = vld [vmem:[#allocation20_spill] sm:$0xff]  ;;  %v3188_v59 = vld [vmem:[#allocation21_spill] sm:$0xff] }
 0x1e2   : > { %2052 = vpow2.f32 %v996_v22  ;;  %v1000_v41 = vmul.f32 1.442695, %v894_v12  ;;  %v1002_v13 = vmul.f32 1.442695, %v895_v10 }
 0x1e3   : > { %2054 = vpow2.f32 %v998_v34  ;;  %1102 = vadd.xlane.f32.xlu1 %v1101_v35 }
 0x1e4   : > { %v2807_v6 = vpop.eup %2044  ;;  %2056 = vpow2.f32 %v1000_v41 }
 0x1e5   : > { %v2809_v8 = vpop.eup %2046  ;;  %2058 = vpow2.f32 %v1002_v13  ;;  %v824_v0 = vpop.xlane.xlu0 %823 }
 0x1e6   : > { %v2811_v58 = vpop.eup %2048  ;;  %v896_v19 = vsub.f32 %v3185_v53, %v824_v0  ;;  %v897_v2 = vsub.f32 %v3186_v31, %v824_v0  ;;  %v1104_v22 = vadd.f32 %v2809_v8, %v2807_v6 }
 0x1e7   : > { %v2817_v12 = vpop.eup %2050  ;;  %v827_v10 = vpop.xlane.xlu1 %826 }
 0x1e8   : > { %v1004_v34 = vmul.f32 1.442695, %v896_v19  ;;  %v1006_v35 = vmul.f32 1.442695, %v897_v2  ;;  %v898_v41 = vsub.f32 %v3187_v48, %v827_v10  ;;  %v899_v38 = vsub.f32 %v3188_v59, %v827_v10  ;;  %1105 = vadd.xlane.f32.xlu0 %v1104_v22 }
 0x1e9   : > { %v1107_v13 = vadd.f32 %v2817_v12, %v2811_v58 }
 0x1ea   : > { %2060 = vpow2.f32 %v1004_v34  ;;  %v1008_v53 = vmul.f32 1.442695, %v898_v41  ;;  %v1010_v14 = vmul.f32 1.442695, %v899_v38 }
 0x1eb   : > { %2062 = vpow2.f32 %v1006_v35  ;;  %1108 = vadd.xlane.f32.xlu1 %v1107_v13 }
 0x1ec   : > { %v2823_v0 = vpop.eup %2052  ;;  %2064 = vpow2.f32 %v1008_v53 }
 0x1ed   : > { %v2825_v31 = vpop.eup %2054  ;;  %2066 = vpow2.f32 %v1010_v14 }
 0x1ee   : > { %v2827_v19 = vpop.eup %2056  ;;  %v1110_v48 = vadd.f32 %v2825_v31, %v2823_v0 }
 0x1ef   : > { %3189 = vst [vmem:[#allocation15_spill] sm:$0xff] %v2827_v19  ;;  %v2831_v59 = vpop.eup %2058 }
 0x1f0   : > { %3190 = vst [vmem:[#allocation16_spill] sm:$0xff] %v2831_v59  ;;  %1111 = vadd.xlane.f32.xlu0 %v1110_v48  ;;  %v1113_v2 = vadd.f32 %v2831_v59, %v2827_v19 }
 0x1f2   : > { %1114 = vadd.xlane.f32.xlu1 %v1113_v2 }
 0x1f4   : > { %v2835_v38 = vpop.eup %2060 }
 0x1f5   : > { %3191 = vst [vmem:[#allocation17_spill] sm:$0xff] %v2835_v38  ;;  %v2837_v22 = vpop.eup %2062 }
 0x1f6   : > { %3192 = vst [vmem:[#allocation18_spill] sm:$0xff] %v2837_v22  ;;  %v2839_v10 = vpop.eup %2064  ;;  %v1116_v14 = vadd.f32 %v2837_v22, %v2835_v38 }
 0x1f7   : > { %3193 = vst [vmem:[#allocation19_spill] sm:$0xff] %v2839_v10  ;;  %v2843_v34 = vpop.eup %2066 }
 0x1f8   : > { %3194 = vst [vmem:[#allocation20_spill] sm:$0xff] %v2843_v34  ;;  %1117 = vadd.xlane.f32.xlu0 %v1116_v14  ;;  %v1119_v35 = vadd.f32 %v2843_v34, %v2839_v10 }
 0x1fa   : > { %1120 = vadd.xlane.f32.xlu1 %v1119_v35 }
 0x22d   : > { %v1052_v41 = vpop.xlane.xlu0 %1051 }
 0x22e   : > { %2068 = vrcp.f32 %v1052_v41 }
 0x231   : > { %v1055_v13 = vpop.xlane.xlu1 %1054  ;;  %v830_v53 = vpop.xlane.xlu0 %829 }
 0x232   : > { %2070 = vrcp.f32 %v1055_v13  ;;  %v900_v48 = vsub.f32 %v2583_v55, %v830_v53  ;;  %v901_v2 = vsub.f32 %v2585_v57, %v830_v53 }
 0x234   : > { %v1012_v19 = vmul.f32 1.442695, %v900_v48  ;;  %v1014_v59 = vmul.f32 1.442695, %v901_v2 }
 0x235   : > { %v1058_v38 = vpop.xlane.xlu0 %1057  ;;  %v833_v14 = vpop.xlane.xlu1 %832 }
 0x236   : > { %2072 = vpow2.f32 %v1012_v19  ;;  %v902_v10 = vsub.f32 %v2587_v61, %v833_v14  ;;  %v903_v35 = vsub.f32 %v2591_v3, %v833_v14 }
 0x237   : > { %2074 = vpow2.f32 %v1014_v59 }
 0x238   : > { %v2069_v41 = vpop.eup %2068  ;;  %2076 = vrcp.f32 %v1058_v38  ;;  %v1016_v13 = vmul.f32 1.442695, %v902_v10  ;;  %v1018_v55 = vmul.f32 1.442695, %v903_v35 }
 0x239   : > { %v1061_v34 = vpop.xlane.xlu1 %1060  ;;  %v836_v57 = vpop.xlane.xlu0 %835  ;;  %v1211_v53 = vmul.f32 %v2069_v41, %v2641_v24  ;;  %v1210_v48 = vmul.f32 %v2069_v41, %v2639_v32 }
 0x23a   : > { %2078 = vpow2.f32 %v1016_v13  ;;  %v904_v2 = vsub.f32 %v2595_v9, %v836_v57  ;;  %v905_v19 = vsub.f32 %v2597_v11, %v836_v57 }
 0x23b   : > { %2080 = vpow2.f32 %v1018_v55  ;;  %v1853_v61 = vpack.c.bf16 %v1211_v53, %v1210_v48 }
 0x23c   : > { %v2071_v3 = vpop.eup %2070  ;;  %2082 = vrcp.f32 %v1061_v34  ;;  %v1020_v59 = vmul.f32 1.442695, %v904_v2  ;;  %v1022_v14 = vmul.f32 1.442695, %v905_v19 }
 0x23d   : > { %v1064_v38 = vpop.xlane.xlu0 %1063  ;;  %v839_v10 = vpop.xlane.xlu1 %838  ;;  %v1213_v35 = vmul.f32 %v2071_v3, %v2651_v23  ;;  %v1212_v22 = vmul.f32 %v2071_v3, %v2647_v18  ;;  %1466 = vst [vmem:[%s2861_s4] sm:$0xff] %v1853_v61 }
 0x23e   : > { %2084 = vpow2.f32 %v1020_v59  ;;  %v906_v9 = vsub.f32 %v2599_v15, %v839_v10  ;;  %v907_v11 = vsub.f32 %v2603_v21, %v839_v10 }
 0x23f   : > { %2086 = vpow2.f32 %v1022_v14  ;;  %v1275_v32 = vpack.c.bf16 %v1213_v35, %v1211_v53  ;;  %v1274_v24 = vpack.c.bf16 %v1212_v22, %v1210_v48  ;;  %v1854_v34 = vpack.c.bf16 %v1213_v35, %v1212_v22 }
 0x240   : > { %v2866_v41 = vpop.eup %2072  ;;  %2088 = vrcp.f32 %v1064_v38  ;;  %v1024_v23 = vmul.f32 1.442695, %v906_v9  ;;  %v1026_v13 = vmul.f32 1.442695, %v907_v11 }
 0x241   : > { %v2868_v18 = vpop.eup %2074  ;;  %1508 = vmatprep.subr.bf16.mxu1 %v1275_v32  ;;  %v1067_v55 = vpop.xlane.xlu1 %1066  ;;  %1467 = vst [vmem:[%s2861_s4 + $0x8] sm:$0xff] %v1854_v34 }
 0x242   : > { %v842_v57 = vpop.xlane.xlu0 %841  ;;  %v2077_v2 = vpop.eup %2076  ;;  %2090 = vpow2.f32 %v1024_v23  ;;  %1509 = vmatpush1.bf16.xpose.msra.mxu1 %v1274_v24  ;;  %v1122_v22 = vadd.f32 %v2868_v18, %v2866_v41 }
 0x243   : > { %v908_v15 = vsub.f32 %v2607_v27, %v842_v57  ;;  %v909_v21 = vsub.f32 %v2609_v33, %v842_v57  ;;  %2092 = vpow2.f32 %v1026_v13  ;;  %v1215_v53 = vmul.f32 %v2077_v2, %v2660_v42 }
 0x244   : > { %v1214_v48 = vmul.f32 %v2077_v2, %v2655_v28  ;;  %v2877_v19 = vpop.eup %2078  ;;  %2094 = vrcp.f32 %v1067_v55  ;;  %1123 = vadd.xlane.f32.xlu0 %v1122_v22 }
 0x245   : > { %v1028_v61 = vmul.f32 1.442695, %v908_v15  ;;  %v1030_v3 = vmul.f32 1.442695, %v909_v21  ;;  %v2879_v59 = vpop.eup %2080  ;;  %v845_v33 = vpop.xlane.xlu1 %844 }
 0x246   : > { %v1070_v27 = vpop.xlane.xlu0 %1069  ;;  %v1855_v14 = vpack.c.bf16 %v1215_v53, %v1214_v48  ;;  %v2083_v38 = vpop.eup %2082  ;;  %v910_v10 = vsub.f32 %v2611_v45, %v845_v33  ;;  %v911_v42 = vsub.f32 %v2615_v5, %v845_v33  ;;  %v1125_v28 = vadd.f32 %v2879_v59, %v2877_v19 }
 0x247   : > { %2096 = vpow2.f32 %v1028_v61  ;;  %v1217_v35 = vmul.f32 %v2083_v38, %v2673_v46  ;;  %v1216_v9 = vmul.f32 %v2083_v38, %v2666_v20 }
 0x248   : > { %2098 = vpow2.f32 %v1030_v3  ;;  %1468 = vst [vmem:[%s2861_s4 + $0x10] sm:$0xff] %v1855_v14  ;;  %v2888_v11 = vpop.eup %2084  ;;  %v1032_v32 = vmul.f32 1.442695, %v910_v10  ;;  %v1034_v24 = vmul.f32 1.442695, %v911_v42  ;;  %1126 = vadd.xlane.f32.xlu1 %v1125_v28 }
 0x249   : > { %2100 = vrcp.f32 %v1070_v27  ;;  %v2890_v34 = vpop.eup %2086  ;;  %v1277_v45 = vpack.c.bf16 %v1217_v35, %v1215_v53  ;;  %v1073_v5 = vpop.xlane.xlu1 %1072  ;;  %v1276_v13 = vpack.c.bf16 %v1216_v9, %v1214_v48  ;;  %v1856_v55 = vpack.c.bf16 %v1217_v35, %v1216_v9 }
 0x24a   : > { %v848_v23 = vpop.xlane.xlu0 %847  ;;  %v2089_v57 = vpop.eup %2088  ;;  %2102 = vpow2.f32 %v1032_v32  ;;  %v1128_v2 = vadd.f32 %v2890_v34, %v2888_v11 }
 0x24b   : > { %v912_v46 = vsub.f32 %v2619_v17, %v848_v23  ;;  %v913_v20 = vsub.f32 %v2621_v49, %v848_v23  ;;  %2104 = vpow2.f32 %v1034_v24  ;;  %1510 = vmatprep.subr.bf16.mxu1 %v1277_v45  ;;  %1469 = vst [vmem:[%s2861_s4 + $0x18] sm:$0xff] %v1856_v55  ;;  %v1219_v15 = vmul.f32 %v2089_v57, %v2682_v50 }
 0x24c   : > { %v1218_v21 = vmul.f32 %v2089_v57, %v2677_v37  ;;  %v2899_v22 = vpop.eup %2090  ;;  %2106 = vrcp.f32 %v1073_v5  ;;  %1511 = vmatpush1.bf16.xpose.msra.mxu1 %v1276_v13  ;;  %1129 = vadd.xlane.f32.xlu0 %v1128_v2 }
 0x24d   : > { %v1036_v53 = vmul.f32 1.442695, %v912_v46  ;;  %v1038_v48 = vmul.f32 1.442695, %v913_v20  ;;  %v2901_v17 = vpop.eup %2092  ;;  %v851_v61 = vpop.xlane.xlu1 %850 }
 0x24e   : > { %v1076_v49 = vpop.xlane.xlu0 %1075  ;;  %v1857_v3 = vpack.c.bf16 %v1219_v15, %v1218_v21  ;;  %v2095_v27 = vpop.eup %2094  ;;  %v914_v33 = vsub.f32 %v2623_v43, %v851_v61  ;;  %v915_v50 = vsub.f32 %v2627_v39, %v851_v61  ;;  %v1131_v37 = vadd.f32 %v2901_v17, %v2899_v22 }
 0x24f   : > { %2108 = vpow2.f32 %v1036_v53  ;;  %v1221_v14 = vmul.f32 %v2095_v27, %v2690_v44  ;;  %v1220_v38 = vmul.f32 %v2095_v27, %v2684_v40 }
 0x250   : > { %2110 = vpow2.f32 %v1038_v48  ;;  %1470 = vst [vmem:[%s2861_s4 + $0x20] sm:$0xff] %v1857_v3  ;;  %v1040_v42 = vmul.f32 1.442695, %v914_v33  ;;  %v1042_v28 = vmul.f32 1.442695, %v915_v50  ;;  %1132 = vadd.xlane.f32.xlu1 %v1131_v37 }
 0x251   : > { %v2910_v10 = vpop.eup %2096  ;;  %2112 = vrcp.f32 %v1076_v49  ;;  %v1279_v43 = vpack.c.bf16 %v1221_v14, %v1219_v15  ;;  %v1079_v39 = vpop.xlane.xlu1 %1078  ;;  %v1278_v9 = vpack.c.bf16 %v1220_v38, %v1218_v21  ;;  %v1858_v32 = vpack.c.bf16 %v1221_v14, %v1220_v38 }
 0x252   : > { %v2912_v35 = vpop.eup %2098  ;;  %2114 = vpow2.f32 %v1040_v42 }
 0x253   : > { %v2101_v24 = vpop.eup %2100  ;;  %v1134_v44 = vadd.f32 %v2912_v35, %v2910_v10  ;;  %2116 = vpow2.f32 %v1042_v28  ;;  %1512 = vmatprep.subr.bf16.mxu1 %v1279_v43  ;;  %1471 = vst [vmem:[%s2861_s4 + $0x28] sm:$0xff] %v1858_v32 }
 0x254   : > { %v1223_v40 = vmul.f32 %v2101_v24, %v2704_v56  ;;  %v1222_v45 = vmul.f32 %v2101_v24, %v2699_v16  ;;  %v2919_v5 = vpop.eup %2102  ;;  %2118 = vrcp.f32 %v1079_v39  ;;  %1513 = vmatpush1.bf16.xpose.msra.mxu1 %v1278_v9 }
 0x255   : > { %1135 = vadd.xlane.f32.xlu0 %v1134_v44  ;;  %v2921_v23 = vpop.eup %2104  ;;  %v1082_v13 = vpop.xlane.xlu0 %1081 }
 0x256   : > { %v1859_v55 = vpack.c.bf16 %v1223_v40, %v1222_v45  ;;  %v2107_v57 = vpop.eup %2106  ;;  %2120 = vrcp.f32 %v1082_v13  ;;  %v1137_v46 = vadd.f32 %v2921_v23, %v2919_v5 }
 0x257   : > { %v1225_v20 = vmul.f32 %v2107_v57, %v2712_v63  ;;  %v1224_v56 = vmul.f32 %v2107_v57, %v2706_v47 }
 0x258   : > { %1472 = vst [vmem:[%s2861_s4 + $0x30] sm:$0xff] %v1859_v55  ;;  %1138 = vadd.xlane.f32.xlu1 %v1137_v46  ;;  %v1085_v2 = vpop.xlane.xlu1 %1084 }
 0x259   : > { %v2928_v16 = vpop.eup %2108  ;;  %2122 = vrcp.f32 %v1085_v2  ;;  %v1281_v21 = vpack.c.bf16 %v1225_v20, %v1223_v40  ;;  %v1280_v53 = vpack.c.bf16 %v1224_v56, %v1222_v45  ;;  %v1860_v48 = vpack.c.bf16 %v1225_v20, %v1224_v56 }
 0x25a   : > { %v2930_v15 = vpop.eup %2110 }
 0x25b   : > { %v2113_v49 = vpop.eup %2112  ;;  %v1140_v61 = vadd.f32 %v2930_v15, %v2928_v16  ;;  %1514 = vmatprep.subr.bf16.mxu1 %v1281_v21  ;;  %1473 = vst [vmem:[%s2861_s4 + $0x38] sm:$0xff] %v1860_v48 }
 0x25c   : > { %v1227_v47 = vmul.f32 %v2113_v49, %v2726_v62  ;;  %v1226_v63 = vmul.f32 %v2113_v49, %v2721_v25  ;;  %v2937_v3 = vpop.eup %2114  ;;  %1515 = vmatpush1.bf16.xpose.msra.mxu1 %v1280_v53  ;;  %v3195_v49 = vld [vmem:[#allocation9_spill] sm:$0xff] }
 0x25d   : > { %1141 = vadd.xlane.f32.xlu0 %v1140_v61  ;;  %v2939_v27 = vpop.eup %2116  ;;  %v1088_v33 = vpop.xlane.xlu0 %1087 }
 0x25e   : > { %v1861_v50 = vpack.c.bf16 %v1227_v47, %v1226_v63  ;;  %v2119_v37 = vpop.eup %2118  ;;  %2124 = vrcp.f32 %v1088_v33  ;;  %v1143_v14 = vadd.f32 %v2939_v27, %v2937_v3 }
 0x25f   : > { %v1229_v38 = vmul.f32 %v2119_v37, %v2734_v36  ;;  %v1228_v62 = vmul.f32 %v2119_v37, %v2728_v52 }
 0x260   : > { %1474 = vst [vmem:[%s2861_s4 + $0x40] sm:$0xff] %v1861_v50  ;;  %v2121_v25 = vpop.eup %2120  ;;  %1144 = vadd.xlane.f32.xlu1 %v1143_v14  ;;  %v1091_v42 = vpop.xlane.xlu1 %1090  ;;  %v3197_v50 = vld [vmem:[#allocation22_spill] sm:$0xff] }
 0x261   : > { %2126 = vrcp.f32 %v1091_v42  ;;  %v1283_v28 = vpack.c.bf16 %v1229_v38, %v1227_v47  ;;  %v1282_v43 = vpack.c.bf16 %v1228_v62, %v1226_v63  ;;  %v1862_v39 = vpack.c.bf16 %v1229_v38, %v1228_v62  ;;  %v3198_v42 = vld [vmem:[#allocation12_spill] sm:$0xff] }
 0x262   : > { %v1231_v9 = vmul.f32 %v2121_v25, %v2745_v30  ;;  %v1230_v32 = vmul.f32 %v2121_v25, %v2743_v26 }
 0x263   : > { %v2123_v24 = vpop.eup %2122  ;;  %1516 = vmatprep.subr.bf16.mxu1 %v1283_v28  ;;  %1475 = vst [vmem:[%s2861_s4 + $0x48] sm:$0xff] %v1862_v39 }
 0x264   : > { %1517 = vmatpush1.bf16.xpose.msra.mxu1 %v1282_v43  ;;  %v1233_v52 = vmul.f32 %v2123_v24, %v2753_v60  ;;  %v1232_v36 = vmul.f32 %v2123_v24, %v2747_v4  ;;  %v1863_v44 = vpack.c.bf16 %v1231_v9, %v1230_v32  ;;  %v3199_v43 = vld [vmem:[#allocation11_spill] sm:$0xff] }
 0x265   : > { %v1094_v40 = vpop.xlane.xlu0 %1093 }
 0x266   : > { %2128 = vrcp.f32 %v1094_v40  ;;  %v1285_v45 = vpack.c.bf16 %v1233_v52, %v1231_v9  ;;  %v1864_v13 = vpack.c.bf16 %v1233_v52, %v1232_v36  ;;  %1476 = vst [vmem:[%s2861_s4 + $0x50] sm:$0xff] %v1863_v44  ;;  %v1284_v60 = vpack.c.bf16 %v1232_v36, %v1230_v32  ;;  %v3200_v52 = vld [vmem:[#allocation14_spill] sm:$0xff]  ;;  %v3201_v44 = vld [vmem:[#allocation13_spill] sm:$0xff] }
 0x268   : > { %v2125_v55 = vpop.eup %2124  ;;  %1518 = vmatprep.subr.bf16.mxu1 %v1285_v45  ;;  %v1097_v30 = vpop.xlane.xlu1 %1096  ;;  %1477 = vst [vmem:[%s2861_s4 + $0x58] sm:$0xff] %v1864_v13 }
 0x269   : > { %2130 = vrcp.f32 %v1097_v30  ;;  %v1235_v26 = vmul.f32 %v2125_v55, %v2761_v51  ;;  %v1234_v57 = vmul.f32 %v2125_v55, %v2759_v7 }
 0x26b   : > { %v2127_v46 = vpop.eup %2126  ;;  %v1865_v4 = vpack.c.bf16 %v1235_v26, %v1234_v57 }
 0x26c   : > { %1519 = vmatpush1.bf16.xpose.msra.mxu1 %v1284_v60  ;;  %v1237_v20 = vmul.f32 %v2127_v46, %v2769_v1  ;;  %v1236_v56 = vmul.f32 %v2127_v46, %v2763_v29  ;;  %v3196_v29 = vld [vmem:[#allocation10_spill] sm:$0xff] }
 0x26d   : > { %v1100_v2 = vpop.xlane.xlu0 %1099  ;;  %1478 = vst [vmem:[%s2861_s4 + $0x60] sm:$0xff] %v1865_v4  ;;  %v1971_v46 = vld [vmem:[%s2974_s13 + $0x4] ss:$8 sps:$4 sm:$0xff]  }
 0x26e   : > { %2132 = vrcp.f32 %v1100_v2  ;;  %v1287_v21 = vpack.c.bf16 %v1237_v20, %v1235_v26  ;;  %v1866_v53 = vpack.c.bf16 %v1237_v20, %v1236_v56  ;;  %v1286_v47 = vpack.c.bf16 %v1236_v56, %v1234_v57  ;;  %1540 = vmatprep.mubr.bf16.mxu1 %v1971_v46 }
 0x270   : > { %v2129_v48 = vpop.eup %2128  ;;  %1520 = vmatprep.subr.bf16.mxu1 %v1287_v21  ;;  %v1103_v51 = vpop.xlane.xlu1 %1102  ;;  %1479 = vst [vmem:[%s2861_s4 + $0x68] sm:$0xff] %v1866_v53 }
 0x271   : > { %2134 = vrcp.f32 %v1103_v51  ;;  %v1239_v7 = vmul.f32 %v2129_v48, %v2777_v54  ;;  %v1238_v61 = vmul.f32 %v2129_v48, %v3195_v49 }
 0x273   : > { %v2131_v1 = vpop.eup %2130  ;;  %v1867_v63 = vpack.c.bf16 %v1239_v7, %v1238_v61 }
 0x274   : > { %1521 = vmatpush1.bf16.xpose.msra.mxu1 %v1286_v47  ;;  %v1241_v33 = vmul.f32 %v2131_v1, %v3196_v29  ;;  %v1240_v37 = vmul.f32 %v2131_v1, %v3197_v50  ;;  %v3202_v47 = vld [vmem:[#allocation16_spill] sm:$0xff]  ;;  %v3203_v1 = vld [vmem:[#allocation15_spill] sm:$0xff] }
 0x275   : > { %v1106_v14 = vpop.xlane.xlu0 %1105  ;;  %1480 = vst [vmem:[%s2861_s4 + $0x70] sm:$0xff] %v1867_v63 }
 0x276   : > { %2136 = vrcp.f32 %v1106_v14  ;;  %v1289_v38 = vpack.c.bf16 %v1241_v33, %v1239_v7  ;;  %v1868_v62 = vpack.c.bf16 %v1241_v33, %v1240_v37  ;;  %v1288_v9 = vpack.c.bf16 %v1240_v37, %v1238_v61  ;;  %v3204_v14 = vld [vmem:[#allocation18_spill] sm:$0xff] }
 0x278   : > { %v2133_v25 = vpop.eup %2132  ;;  %1522 = vmatprep.subr.bf16.mxu1 %v1289_v38  ;;  %v1109_v54 = vpop.xlane.xlu1 %1108  ;;  %1481 = vst [vmem:[%s2861_s4 + $0x78] sm:$0xff] %v1868_v62  ;;  %v3205_v38 = vld [vmem:[#allocation17_spill] sm:$0xff] }
 0x279   : > { %2138 = vrcp.f32 %v1109_v54  ;;  %v1243_v28 = vmul.f32 %v2133_v25, %v3198_v42  ;;  %v1242_v39 = vmul.f32 %v2133_v25, %v3199_v43  ;;  %v3206_v54 = vld [vmem:[#allocation20_spill] sm:$0xff] }
 0x27b   : > { %v2135_v32 = vpop.eup %2134  ;;  %v1869_v24 = vpack.c.bf16 %v1243_v28, %v1242_v39 }
 0x27c   : > { %1523 = vmatpush1.bf16.xpose.msra.mxu1 %v1288_v9  ;;  %v1245_v36 = vmul.f32 %v2135_v32, %v3200_v52  ;;  %v1244_v40 = vmul.f32 %v2135_v32, %v3201_v44 }
 0x27d   : > { %v1112_v45 = vpop.xlane.xlu0 %1111  ;;  %1482 = vst [vmem:[%s2861_s4 + $0x80] sm:$0xff] %v1869_v24 }
 0x27e   : > { %2140 = vrcp.f32 %v1112_v45  ;;  %v1291_v13 = vpack.c.bf16 %v1245_v36, %v1243_v28  ;;  %v1870_v55 = vpack.c.bf16 %v1245_v36, %v1244_v40  ;;  %v1290_v4 = vpack.c.bf16 %v1244_v40, %v1242_v39  ;;  %v3207_v28 = vld [vmem:[#allocation19_spill] sm:$0xff] }
 0x27f   : > { %v1115_v30 = vpop.xlane.xlu1 %1114 }
 0x280   : > { %v2137_v26 = vpop.eup %2136  ;;  %1524 = vmatprep.subr.bf16.mxu1 %v1291_v13  ;;  %2142 = vrcp.f32 %v1115_v30  ;;  %1483 = vst [vmem:[%s2861_s4 + $0x88] sm:$0xff] %v1870_v55 }
 0x281   : > { %v1247_v57 = vmul.f32 %v2137_v26, %v2809_v8  ;;  %v1246_v60 = vmul.f32 %v2137_v26, %v2807_v6 }
 0x283   : > { %v2139_v20 = vpop.eup %2138  ;;  %v1871_v56 = vpack.c.bf16 %v1247_v57, %v1246_v60 }
 0x284   : > { %1525 = vmatpush1.bf16.xpose.msra.mxu1 %v1290_v4  ;;  %v1249_v2 = vmul.f32 %v2139_v20, %v2817_v12  ;;  %v1248_v21 = vmul.f32 %v2139_v20, %v2811_v58 }
 0x285   : > { %v1118_v53 = vpop.xlane.xlu0 %1117  ;;  %1484 = vst [vmem:[%s2861_s4 + $0x90] sm:$0xff] %v1871_v56 }
 0x286   : > { %2144 = vrcp.f32 %v1118_v53  ;;  %v1293_v48 = vpack.c.bf16 %v1249_v2, %v1247_v57  ;;  %v1872_v51 = vpack.c.bf16 %v1249_v2, %v1248_v21  ;;  %v1292_v12 = vpack.c.bf16 %v1248_v21, %v1246_v60 }
 0x287   : > { %v1121_v8 = vpop.xlane.xlu1 %1120 }
 0x288   : > { %v2141_v7 = vpop.eup %2140  ;;  %1526 = vmatprep.subr.bf16.mxu1 %v1293_v48  ;;  %2146 = vrcp.f32 %v1121_v8  ;;  %1485 = vst [vmem:[%s2861_s4 + $0x98] sm:$0xff] %v1872_v51 }
 0x289   : > { %v1251_v6 = vmul.f32 %v2141_v7, %v2825_v31  ;;  %v1250_v49 = vmul.f32 %v2141_v7, %v2823_v0 }
 0x28a   : > { %v2143_v61 = vpop.eup %2142 }
 0x28b   : > { %v1253_v58 = vmul.f32 %v2143_v61, %v3202_v47  ;;  %v1252_v63 = vmul.f32 %v2143_v61, %v3203_v1  ;;  %v1873_v29 = vpack.c.bf16 %v1251_v6, %v1250_v49 }
 0x28c   : > { %1527 = vmatpush1.bf16.xpose.msra.mxu1 %v1292_v12 }
 0x28d   : > { %v1295_v33 = vpack.c.bf16 %v1253_v58, %v1251_v6  ;;  %v1874_v50 = vpack.c.bf16 %v1253_v58, %v1252_v63  ;;  %1486 = vst [vmem:[%s2861_s4 + $0xa0] sm:$0xff] %v1873_v29  ;;  %v1294_v25 = vpack.c.bf16 %v1252_v63, %v1250_v49 }
 0x28f   : > { %1528 = vmatprep.subr.bf16.mxu1 %v1295_v33  ;;  %1487 = vst [vmem:[%s2861_s4 + $0xa8] sm:$0xff] %v1874_v50 }
 0x290   : > { %v2145_v37 = vpop.eup %2144 }
 0x291   : > { %v1255_v31 = vmul.f32 %v2145_v37, %v3204_v14  ;;  %v1254_v0 = vmul.f32 %v2145_v37, %v3205_v38 }
 0x292   : > { %v2147_v62 = vpop.eup %2146 }
 0x293   : > { %v1257_v42 = vmul.f32 %v2147_v62, %v3206_v54  ;;  %v1256_v43 = vmul.f32 %v2147_v62, %v3207_v28  ;;  %v1875_v39 = vpack.c.bf16 %v1255_v31, %v1254_v0 }
 0x294   : > { %1529 = vmatpush1.bf16.xpose.msra.mxu1 %v1294_v25 }
 0x295   : > { %v1297_v9 = vpack.c.bf16 %v1257_v42, %v1255_v31  ;;  %v1876_v32 = vpack.c.bf16 %v1257_v42, %v1256_v43  ;;  %1488 = vst [vmem:[%s2861_s4 + $0xb0] sm:$0xff] %v1875_v39  ;;  %v1296_v24 = vpack.c.bf16 %v1256_v43, %v1254_v0 }
 0x297   : > { %1530 = vmatprep.subr.bf16.mxu1 %v1297_v9  ;;  %1489 = vst [vmem:[%s2861_s4 + $0xb8] sm:$0xff] %v1876_v32 }
 0x29c   : > { %1531 = vmatpush1.bf16.xpose.msra.mxu1 %v1296_v24 }
 0x2d1   : > { %v1124_v52 = vpop.xlane.xlu0 %1123 }
 0x2d2   : > { %2148 = vrcp.f32 %v1124_v52 }
 0x2d5   : > { %v1127_v36 = vpop.xlane.xlu1 %1126 }
 0x2d6   : > { %2150 = vrcp.f32 %v1127_v36 }
 0x2d9   : > { %v1130_v44 = vpop.xlane.xlu0 %1129 }
 0x2da   : > { %2152 = vrcp.f32 %v1130_v44 }
 0x2dc   : > { %v2149_v40 = vpop.eup %2148 }
 0x2dd   : > { %v1133_v45 = vpop.xlane.xlu1 %1132  ;;  %v1259_v13 = vmul.f32 %v2149_v40, %v2868_v18  ;;  %v1258_v55 = vmul.f32 %v2149_v40, %v2866_v41 }
 0x2de   : > { %2154 = vrcp.f32 %v1133_v45 }
 0x2df   : > { %v1877_v30 = vpack.c.bf16 %v1259_v13, %v1258_v55 }
 0x2e0   : > { %v2151_v26 = vpop.eup %2150 }
 0x2e1   : > { %v1261_v60 = vmul.f32 %v2151_v26, %v2879_v59  ;;  %v1260_v46 = vmul.f32 %v2151_v26, %v2877_v19  ;;  %1490 = vst [vmem:[%s2861_s4 + $0xc0] sm:$0xff] %v1877_v30 }
 0x2e2   : > { %v1136_v57 = vpop.xlane.xlu0 %1135 }
 0x2e3   : > { %2156 = vrcp.f32 %v1136_v57  ;;  %v1299_v4 = vpack.c.bf16 %v1261_v60, %v1259_v13  ;;  %v1298_v20 = vpack.c.bf16 %v1260_v46, %v1258_v55  ;;  %v1878_v56 = vpack.c.bf16 %v1261_v60, %v1260_v46 }
 0x2e4   : > { %v2153_v2 = vpop.eup %2152 }
 0x2e5   : > { %1532 = vmatprep.subr.bf16.mxu1 %v1299_v4  ;;  %v1139_v18 = vpop.xlane.xlu1 %1138  ;;  %1491 = vst [vmem:[%s2861_s4 + $0xc8] sm:$0xff] %v1878_v56  ;;  %v1263_v41 = vmul.f32 %v2153_v2, %v2890_v34  ;;  %v1262_v21 = vmul.f32 %v2153_v2, %v2888_v11 }
 0x2e6   : > { %2158 = vrcp.f32 %v1139_v18  ;;  %1533 = vmatpush1.bf16.xpose.msra.mxu1 %v1298_v20 }
 0x2e7   : > { %v1879_v59 = vpack.c.bf16 %v1263_v41, %v1262_v21 }
 0x2e8   : > { %v2155_v53 = vpop.eup %2154 }
 0x2e9   : > { %v1265_v48 = vmul.f32 %v2155_v53, %v2901_v17  ;;  %v1264_v51 = vmul.f32 %v2155_v53, %v2899_v22  ;;  %1492 = vst [vmem:[%s2861_s4 + $0xd0] sm:$0xff] %v1879_v59 }
 0x2ea   : > { %v1142_v19 = vpop.xlane.xlu0 %1141 }
 0x2eb   : > { %2160 = vrcp.f32 %v1142_v19  ;;  %v1301_v8 = vpack.c.bf16 %v1265_v48, %v1263_v41  ;;  %v1300_v7 = vpack.c.bf16 %v1264_v51, %v1262_v21  ;;  %v1880_v6 = vpack.c.bf16 %v1265_v48, %v1264_v51 }
 0x2ed   : > { %v2157_v49 = vpop.eup %2156  ;;  %1534 = vmatprep.subr.bf16.mxu1 %v1301_v8  ;;  %v1145_v34 = vpop.xlane.xlu1 %1144  ;;  %1493 = vst [vmem:[%s2861_s4 + $0xd8] sm:$0xff] %v1880_v6 }
 0x2ee   : > { %v1267_v11 = vmul.f32 %v2157_v49, %v2912_v35  ;;  %v1266_v61 = vmul.f32 %v2157_v49, %v2910_v10  ;;  %2162 = vrcp.f32 %v1145_v34  ;;  %1535 = vmatpush1.bf16.xpose.msra.mxu1 %v1300_v7 }
 0x2f0   : > { %v1881_v17 = vpack.c.bf16 %v1267_v11, %v1266_v61  ;;  %v2159_v12 = vpop.eup %2158 }
 0x2f1   : > { %v1269_v22 = vmul.f32 %v2159_v12, %v2921_v23  ;;  %v1268_v47 = vmul.f32 %v2159_v12, %v2919_v5 }
 0x2f2   : > { %1494 = vst [vmem:[%s2861_s4 + $0xe0] sm:$0xff] %v1881_v17 }
 0x2f3   : > { %v1303_v58 = vpack.c.bf16 %v1269_v22, %v1267_v11  ;;  %v1302_v1 = vpack.c.bf16 %v1268_v47, %v1266_v61  ;;  %v1882_v63 = vpack.c.bf16 %v1269_v22, %v1268_v47 }
 0x2f5   : > { %v2161_v29 = vpop.eup %2160  ;;  %1536 = vmatprep.subr.bf16.mxu1 %v1303_v58  ;;  %1495 = vst [vmem:[%s2861_s4 + $0xe8] sm:$0xff] %v1882_v63 }
 0x2f6   : > { %v1271_v10 = vmul.f32 %v2161_v29, %v2930_v15  ;;  %v1270_v35 = vmul.f32 %v2161_v29, %v2928_v16  ;;  %1537 = vmatpush1.bf16.xpose.msra.mxu1 %v1302_v1  ;;  %v1969_v15 = vld [vmem:[%s2974_s13] ss:$8 sps:$4 sm:$0xff]  }
 0x2f8   : > { %v1883_v23 = vpack.c.bf16 %v1271_v10, %v1270_v35  ;;  %v2163_v33 = vpop.eup %2162 }
 0x2f9   : > { %v1273_v5 = vmul.f32 %v2163_v33, %v2939_v27  ;;  %v1272_v50 = vmul.f32 %v2163_v33, %v2937_v3 }
 0x2fa   : > { %1496 = vst [vmem:[%s2861_s4 + $0xf0] sm:$0xff] %v1883_v23 }
 0x2fb   : > { %v1305_v37 = vpack.c.bf16 %v1273_v5, %v1271_v10  ;;  %v1304_v14 = vpack.c.bf16 %v1272_v50, %v1270_v35  ;;  %v1884_v31 = vpack.c.bf16 %v1273_v5, %v1272_v50 }
 0x2fd   : > { %1538 = vmatprep.subr.bf16.mxu1 %v1305_v37  ;;  %1497 = vst [vmem:[%s2861_s4 + $0xf8] sm:$0xff] %v1884_v31  ;;  %s2170_s4 = scalar_lea.vmem %s2169_s29, 8192 }
 0x2fe   : > { %1539 = vmatpush1.bf16.xpose.msra.mxu1 %v1304_v14  ;;  %p2172_p2 = scmp.lt.s32.totalorder %s2170_s4, %s2164_s20 }
 0x300   : > { %p2173_p3 = por %p2172_p2, %p2171_p1 }
 0x302   : > { %p2174_p5 = pnand %p2173_p3, %p2167_p0 }
 0x305   : > { %1541 = vmatmul.mubr.bf16.vlgmr.msra.gmra.mrb[0].mxu1 %v1969_v15 }
 0x306   : > { %2177 = shalt.err (!%p2174_p5)
}
 0x307   : > { %s2178_s7 = scalar_lea.hbm %s3026_s18, 4096  ;;  %s2182_s14 = scalar_lea.hbm %s3119_s6, 8192 }
 0x308   : > { %p2179_p6 = scmp.ne.s32.totalorder %s3026_s18, %s2178_s7  ;;  %p2183_p10 = scmp.lt.u32.totalorder %s3026_s18, %s3119_s6 }
 0x309   : > { %p2184_p11 = scmp.lt.u32.totalorder %s2182_s14, %s2178_s7  ;;  %p2186_p13 = scmp.lt.u32.totalorder %s2178_s7, %s3026_s18 }
 0x30a   : > { %p2180_p7 = pnand %p2179_p6, %p2362_p4 }
 0x30b   : > { %p2185_p12 = por %p2184_p11, %p2183_p10 }
 0x30c   : > { %p2181_p9 = pneg %p2180_p7 }
 0x30d   : > { %p2187_p0 = por %p2186_p13, %p2185_p12 }
 0x30f   : > { %p2188_p1 = pnand %p2187_p0, %p2181_p9 }
 0x311   : > { %2191 = shalt.err (!%p2188_p1)
}
 0x312   : > { %s2279_s20 = smov 128   ;;  %s2280_s22 = smov 8  }
 0x313   : > { %1888 = dma.vmem_to_hbm [thread:$0]  (%p2362_p4), %s3028_s15, 4096, %s3026_s18, %s1570_s19, %s2279_s20, %s2279_s20, %s2280_s22  }
 0x314   : > { %s370_s29 = sld [smem:[#allocation2]]  ;;  %s1852_s4 = sshll.u32 %s2380_s12, 5 }
 0x315   : > { %s365_s7 = scalar_lea.vmem %s3116_s3, %s1852_s4  ;;  %s1765_s14 = sshll.u32 %s2850_s21, 5 }
 0x316   : > { %v1046_v3 = vld [vmem:[%s365_s7] sm:$0xff]  ;;  %v1047_v0 = vld [vmem:[%s365_s7 + $0x8] sm:$0xff]  ;;  %s330_s16 = scalar_lea.vmem [#allocation3], %s1765_s14  ;;  %v1048_v54 = vld [vmem:[%s365_s7 + $0x10] sm:$0xff]  ;;  %s1885_s12 = sshll.u32 %s2266_s26, 9 }
 0x317   : > { %s1585_s17 = sshll.u32 %s330_s16, 4  ;;  %v1049_v39 = vld [vmem:[%s365_s7 + $0x18] sm:$0xff]  ;;  %s3065_s19 = scalar_lea.hbm %s3118_s5, %s1885_s12  ;;  %s3060_s17 = int_to_ptr.vmem [resolvable:$true] %s1585_s17 }
 0x318   : > { %s1565_s20 = scalar_lea.sflag [#allocation4], %s2850_s21  ;;  %s2192_s26 = scalar_lea.vmem %s3060_s17, 512 }
 0x319   : > { %p2193_p2 = scmp.ne.s32.totalorder %s3060_s17, %s2192_s26  ;;  %s2281_s22 = smov [#allocation3]  }
 0x31a   : > { %v1551_v16 = vstv %s370_s29  ;;  %s2196_s29 = sshll.u32 %s2281_s22, 4  ;;  %s2197_s29 = int_to_ptr.vmem [resolvable:$false] %s2196_s29 }
 0x31b   : > { %p2194_p3 = pnand %p2193_p2, %p2362_p4  ;;  %s2198_s4 = scalar_lea.vmem %s2197_s29, 1024 }
 0x31c   : > { %p2199_p6 = scmp.lt.s32.totalorder %s3060_s17, %s2197_s29  ;;  %p2200_p7 = scmp.lt.s32.totalorder %s2198_s4, %s2192_s26 }
 0x31d   : > { %p2195_p5 = pneg %p2194_p3 }
 0x31e   : > { %p2201_p9 = por %p2200_p7, %p2199_p6 }
 0x320   : > { %p2202_p10 = pnand %p2201_p9, %p2195_p5 }
 0x3d8   : > { %v1542_v27 = vpop.f32.mrb[0].mxu1 }
 0x3d9   : > { %v1552_v38 = vmul.f32 %v1551_v16, %v1542_v27  ;;  %v1544_v62 = vpop.f32.mrb[1].mxu1 }
 0x3da   : > { %v1553_v25 = vmul.f32 %v1551_v16, %v1544_v62  ;;  %v1546_v42 = vpop.f32.mrb[2].mxu1 }
 0x3db   : > { %v1556_v28 = vadd.f32 %v1552_v38, %v1046_v3  ;;  %v1554_v43 = vmul.f32 %v1551_v16, %v1546_v42  ;;  %v1548_v9 = vpop.f32.mrb[3].mxu1 }
 0x3dc   : > { %v1557_v32 = vadd.f32 %v1553_v25, %v1047_v0  ;;  %v1555_v24 = vmul.f32 %v1551_v16, %v1548_v9 }
 0x3dd   : > { %1560 = vst [vmem:[%s330_s16] sm:$0xff] %v1556_v28  ;;  %v1558_v52 = vadd.f32 %v1554_v43, %v1048_v54 }
 0x3de   : > { %1561 = vst [vmem:[%s330_s16 + $0x8] sm:$0xff] %v1557_v32  ;;  %v1559_v36 = vadd.f32 %v1555_v24, %v1049_v39 }
 0x3df   : > { %1562 = vst [vmem:[%s330_s16 + $0x10] sm:$0xff] %v1558_v52 }
 0x3e0   : > { %1563 = vst [vmem:[%s330_s16 + $0x18] sm:$0xff] %v1559_v36 }
 0x3e1   : > { %2205 = shalt.err (!%p2202_p10)
}
 0x3e2   : > { %s2206_s9 = scalar_lea.hbm %s3065_s19, 512  ;;  %s2210_s14 = scalar_lea.hbm %s3118_s5, 1024 }
 0x3e3   : > { %p2207_p11 = scmp.ne.s32.totalorder %s3065_s19, %s2206_s9  ;;  %p2211_p0 = scmp.lt.u32.totalorder %s3065_s19, %s3118_s5 }
 0x3e4   : > { %p2212_p1 = scmp.lt.u32.totalorder %s2210_s14, %s2206_s9  ;;  %p2214_p3 = scmp.lt.u32.totalorder %s2206_s9, %s3065_s19 }
 0x3e5   : > { %p2208_p12 = pnand %p2207_p11, %p2362_p4 }
 0x3e6   : > { %p2213_p2 = por %p2212_p1, %p2211_p0 }
 0x3e7   : > { %p2209_p13 = pneg %p2208_p12 }
 0x3e8   : > { %p2215_p5 = por %p2214_p3, %p2213_p2 }
 0x3ea   : > { %p2216_p6 = pnand %p2215_p5, %p2209_p13 }
 0x3ec   : > { %2219 = shalt.err (!%p2216_p6)
}
 0x3ed   : > { %s2282_s15 = smov 256   ;;  %s2283_s18 = smov 16  }
 0x3ee   : > { %1887 = dma.vmem_to_hbm [thread:$0]  (%p2362_p4), %s3060_s17, 512, %s3065_s19, %s1565_s20, %s2282_s15, %s2282_s15, %s2283_s18  }
 0x3ef PF: > { %p1898_p7 = scmp.ge.s32.totalorder %s2274_s28, 2  ;;  %s1619_s26 = sand.u32 1, %s2254_s23  }
 0x3f0   : > { %s1620_s22 = scalar_lea.sflag [#allocation4], %s1619_s26 }
 0x3f1   : > { %p1892_p9 = pnand %p1898_p7, %p2369_p8 }
 0x3f3   : > { %2245 = dma.done.wait (!%p1892_p9), %s1620_s22, 512  }
 0x3f4   : > { %2247 = vsyncadd (!%p1892_p9), %s1620_s22, 4294966784  ;;  %s1629_s29 = scalar_lea.sflag [#allocation6], %s1619_s26 }
 0x3f5   : > { %2249 = dma.done.wait (!%p1892_p9), %s1629_s29, 4096  }
 0x3f6   : > { %2251 = vsyncadd (!%p1892_p9), %s1629_s29, 4294963200  ;;  %s24_s28 = sadd.s32 1, %s2274_s28   ;;  %s3208_s23 = smov %s2258_s24 }
 0x3f7   : > { %p21_p10 = scmp.ge.s32.totalorder %s24_s28, 4   ;;  %s3209_s24 = smov %s2262_s25 }
 0x3f8   : > { %s3210_s25 = smov %s2375_s11  ;;  %s3211_s26 = smov %s2270_s27 }
 0x3f9   : > { %s3212_s27 = smov %s3214_s30  ;;  %23 = sbr.rel (!%p21_p10) target bundleno = 8 (0x8), region = 101 }
 0x400   :  { %1634 = vsyncpa [#allocation4], 1 }
 0x401   :  { %1636 = vsyncpa [#allocation4 + $0x1], 1 }
 0x402   :  { %1637 = vsyncpa [#allocation6], 1 }
 0x403   :  { %1639 = vsyncpa [#allocation6 + $0x1], 1 }

</bundles_post_ra>
